<compile_context>
chip_gen: v5e
topology: v5e:2x2
jax: 0.10.0
libtpu: 0.0.40
codegen_flags: <defaults>
</compile_context>

<pallas_src>
import functools

import jax
import jax.numpy as jnp
from jax.experimental import pallas as pl
from jax.experimental.pallas import tpu as pltpu

EPS = 1e-8

_VMEM = pl.BlockSpec(memory_space=pltpu.MemorySpace.VMEM)


# --------------------------- bias slab layout --------------------------------

def _bias_layout(hidden, latent, vision_dim, audio_dim):
    """Flat [1, N] bias slab; every bias starts at a 128-lane boundary."""
    entries = [
        ("ev_b1", hidden),
        ("ea_b1", hidden),
        ("ev_bh", 2 * latent),
        ("ea_bh", 2 * latent),
        ("dec_b1", 2 * hidden),       # fused decoder first-layer bias
        ("dv_b2", vision_dim),
        ("da_b2", audio_dim),
    ]
    layout, off = {}, 0
    for name, width in entries:
        layout[name] = (off, width)
        off += ((width + 127) // 128) * 128
    return layout, off


# ----------------------------- fused Pallas kernel ---------------------------

def _fused_multivae_kernel(
    xv_ref, xa_ref, noise_ref,
    enc_w1_ref, enc_wh_ref, dec_w1_ref, dec_w2_ref, bias_ref,
    vrec_ref, arec_ref, mulv_ref,
    *, latent, hidden, vision_dim, audio_dim, bias_off):

    def bias(name):
        off, width = bias_off[name]
        return bias_ref[:, off:off + width]          # [1, width] f32 (static slice)

    # ---- encoders: bf16 MXU operands, f32 accumulate / elementwise ----
    xv_b = xv_ref[...].astype(jnp.bfloat16)
    hv = jnp.dot(xv_b, enc_w1_ref[:vision_dim, :],
                 preferred_element_type=jnp.float32) + bias("ev_b1")
    hv = jnp.maximum(hv, 0.0)
    yv = jnp.dot(hv.astype(jnp.bfloat16), enc_wh_ref[0],
                 preferred_element_type=jnp.float32) + bias("ev_bh")

    xa_b = xa_ref[...].astype(jnp.bfloat16)
    ha = jnp.dot(xa_b, enc_w1_ref[vision_dim:, :],
                 preferred_element_type=jnp.float32) + bias("ea_b1")
    ha = jnp.maximum(ha, 0.0)
    ya = jnp.dot(ha.astype(jnp.bfloat16), enc_wh_ref[1],
                 preferred_element_type=jnp.float32) + bias("ea_bh")

    mu_v, lv_v = yv[:, :latent], yv[:, latent:]
    mu_a, lv_a = ya[:, :latent], ya[:, latent:]

    # ---- product of experts; zero-mean/zero-logvar prior folded analytically
    # reference: var = exp(logvar)+eps ; t = 1/(var+eps) = 1/(exp(logvar)+2eps)
    # prior expert has mu=0, logvar=0 => t_prior = 1/(1+2eps), mu term = 0
    t_prior = 1.0 / (1.0 + 2.0 * EPS)
    t_v = pl.reciprocal(jnp.exp(lv_v) + 2.0 * EPS, approx=True)
    t_a = pl.reciprocal(jnp.exp(lv_a) + 2.0 * EPS, approx=True)
    pd_var = pl.reciprocal(t_prior + t_v + t_a, approx=True)
    pd_mu = (mu_v * t_v + mu_a * t_a) * pd_var
    pd_logvar = jnp.log(pd_var + EPS)

    # lane-dense (>=128 wide) slab; two direct slice stores, no lane concat
    mulv_ref[:, :latent] = pd_mu
    mulv_ref[:, latent:2 * latent] = pd_logvar

    # ---- reparameterize (training path: sample with supplied noise) ----
    z = noise_ref[...] * jnp.exp(0.5 * pd_logvar) + pd_mu

    # ---- decoders: fused first layer z @ [latent, 2*hidden], one ReLU ----
    hd = jnp.dot(z.astype(jnp.bfloat16), dec_w1_ref[...],
                 preferred_element_type=jnp.float32) + bias("dec_b1")
    hd = jnp.maximum(hd, 0.0)
    hdv = hd[:, :hidden].astype(jnp.bfloat16)      # lane-128 boundary split
    hda = hd[:, hidden:].astype(jnp.bfloat16)

    # vision decoder: sigmoid(hdv @ W2 + b2)
    vrec_ref[...] = jax.nn.sigmoid(
        jnp.dot(hdv, dec_w2_ref[:, :vision_dim],
                preferred_element_type=jnp.float32) + bias("dv_b2"))
    # audio decoder: hda @ W2 + b2
    arec_ref[...] = jnp.dot(hda, dec_w2_ref[:, vision_dim:],
                            preferred_element_type=jnp.float32) + bias("da_b2")


# ------------------------------- parameters ---------------------------------

def _dense(key, fan_in, fan_out):
    w = jax.random.normal(key, (fan_in, fan_out), jnp.float32) / jnp.sqrt(
        jnp.float32(fan_in))
    b = jnp.zeros((1, fan_out), jnp.float32)
    return w, b


def init_params(key, vision_dim, audio_dim, hidden, latent):
    ks = jax.random.split(key, 10)
    p = {}

    w1, b1 = _dense(ks[0], vision_dim, hidden)
    wmu, bmu = _dense(ks[1], hidden, latent)
    wlv, blv = _dense(ks[2], hidden, latent)
    p["enc_vision"] = dict(w1=w1, b1=b1, wmu=wmu, bmu=bmu, wlv=wlv, blv=blv)

    w1, b1 = _dense(ks[3], audio_dim, hidden)
    wmu, bmu = _dense(ks[4], hidden, latent)
    wlv, blv = _dense(ks[5], hidden, latent)
    p["enc_audio"] = dict(w1=w1, b1=b1, wmu=wmu, bmu=bmu, wlv=wlv, blv=blv)

    w1, b1 = _dense(ks[6], latent, hidden)
    w2, b2 = _dense(ks[7], hidden, vision_dim)
    p["dec_vision"] = dict(w1=w1, b1=b1, w2=w2, b2=b2)

    w1, b1 = _dense(ks[8], latent, hidden)
    w2, b2 = _dense(ks[9], hidden, audio_dim)
    p["dec_audio"] = dict(w1=w1, b1=b1, w2=w2, b2=b2)
    return p


def pack_params(params):
    """One-time packing (outside jit): bf16 weights, fused buffers, bias slab.

    Keep the mu|logvar concat order [wmu, wlv]: mu = head[:, :latent].
    The returned pytree contains only arrays (jit-safe).
    """
    ev, ea = params["enc_vision"], params["enc_audio"]
    dv, da = params["dec_vision"], params["dec_audio"]
    vision_dim, hidden = ev["w1"].shape
    audio_dim = ea["w1"].shape[0]
    latent = ev["wmu"].shape[1]

    enc_w1 = jnp.concatenate([ev["w1"], ea["w1"]], axis=0).astype(jnp.bfloat16)
    enc_wh = jnp.stack(
        [jnp.concatenate([ev["wmu"], ev["wlv"]], axis=1),
         jnp.concatenate([ea["wmu"], ea["wlv"]], axis=1)],
        axis=0).astype(jnp.bfloat16)
    dec_w1 = jnp.concatenate([dv["w1"], da["w1"]], axis=1).astype(jnp.bfloat16)
    dec_w2 = jnp.concatenate([dv["w2"], da["w2"]], axis=1).astype(jnp.bfloat16)

    layout, total = _bias_layout(hidden, latent, vision_dim, audio_dim)
    flat = jnp.zeros((1, total), jnp.float32)

    def put(buf, name, vec):
        off, width = layout[name]
        return buf.at[0, off:off + width].set(vec.reshape(-1))

    flat = put(flat, "ev_b1", ev["b1"])
    flat = put(flat, "ea_b1", ea["b1"])
    flat = put(flat, "ev_bh", jnp.concatenate([ev["bmu"], ev["blv"]], axis=1))
    flat = put(flat, "ea_bh", jnp.concatenate([ea["bmu"], ea["blv"]], axis=1))
    flat = put(flat, "dec_b1", jnp.concatenate([dv["b1"], da["b1"]], axis=1))
    flat = put(flat, "dv_b2", dv["b2"])
    flat = put(flat, "da_b2", da["b2"])

    return dict(enc_w1=enc_w1, enc_wh=enc_wh, dec_w1=dec_w1, dec_w2=dec_w2,
                biases=flat)


# ------------------------------ forward pass ---------------------------------

def multivae_forward(packed, vision, audio, noise):
    """Mirrors MultiVAE.forward(vision=..., audio=...) — single fused kernel."""
    b = vision.shape[0]
    xv = vision.reshape(b, -1)                    # NCHW -> [B, C*H*W]
    xa = audio

    # all sizes derived from static array shapes (nothing traced)
    latent = noise.shape[1]
    hidden = packed["enc_w1"].shape[1]
    vision_dim = xv.shape[1]
    audio_dim = xa.shape[1]
    bias_off, _ = _bias_layout(hidden, latent, vision_dim, audio_dim)
    mulv_w = max(128, ((2 * latent + 127) // 128) * 128)   # lane-dense slab

    kernel = functools.partial(
        _fused_multivae_kernel, latent=latent, hidden=hidden,
        vision_dim=vision_dim, audio_dim=audio_dim, bias_off=bias_off)

    vrec, arec, mulv = pl.pallas_call(
        kernel,
        out_shape=(jax.ShapeDtypeStruct((b, vision_dim), jnp.float32),
                   jax.ShapeDtypeStruct((b, audio_dim), jnp.float32),
                   jax.ShapeDtypeStruct((b, mulv_w), jnp.float32)),
        in_specs=[_VMEM] * 8,
        out_specs=(_VMEM, _VMEM, _VMEM),
        compiler_params=pltpu.CompilerParams(
            vmem_limit_bytes=32 * 1024 * 1024),
    )(xv, xa, noise,
      packed["enc_w1"], packed["enc_wh"],
      packed["dec_w1"], packed["dec_w2"],
      packed["biases"])

    vision_recon = vrec.reshape(vision.shape)
    audio_recon = arec
    mu = mulv[:, :latent]
    logvar = mulv[:, latent:2 * latent]
    return vision_recon, audio_recon, mu, logvar


# ---------------------------------- main -------------------------------------

if __name__ == "__main__":
    B, C, H, W = 2, 4, 16, 16
    AUDIO_DIM = 128
    HIDDEN = 128
    LATENT = 32

    key = jax.random.PRNGKey(0)
    k_param, k_vis, k_aud, k_noise = jax.random.split(key, 4)

    params = init_params(k_param, C * H * W, AUDIO_DIM, HIDDEN, LATENT)
    packed = pack_params(params)     # one-time bf16 packing, outside jit

    vision = jax.random.normal(k_vis, (B, C, H, W), jnp.float32)
    audio = jax.random.normal(k_aud, (B, AUDIO_DIM), jnp.float32)
    noise = jax.random.normal(k_noise, (B, LATENT), jnp.float32)

    fwd = jax.jit(multivae_forward)
    vision_recon, audio_recon, mu, logvar = fwd(packed, vision, audio, noise)
    jax.block_until_ready((vision_recon, audio_recon, mu, logvar))

    assert vision_recon.shape == (B, C, H, W)
    assert audio_recon.shape == (B, AUDIO_DIM)
    assert mu.shape == (B, LATENT) and logvar.shape == (B, LATENT)
    assert bool(jnp.all(jnp.isfinite(vision_recon)))
    assert bool(jnp.all(jnp.isfinite(audio_recon)))
    assert bool(jnp.all(jnp.isfinite(mu))) and bool(jnp.all(jnp.isfinite(logvar)))
    print("KERNEL_OK")
</pallas_src>

<mosaic_0001>
module attributes {stable_mosaic.version = 11 : i64} {
  func.func @_fused_multivae_kernel(%arg0: memref<2x1024xf32, #tpu.memory_space<vmem>>, %arg1: memref<2x128xf32, #tpu.memory_space<vmem>>, %arg2: memref<2x32xf32, #tpu.memory_space<vmem>>, %arg3: memref<1152x128xbf16, #tpu.memory_space<vmem>>, %arg4: memref<2x128x64xbf16, #tpu.memory_space<vmem>>, %arg5: memref<32x256xbf16, #tpu.memory_space<vmem>>, %arg6: memref<128x1152xbf16, #tpu.memory_space<vmem>>, %arg7: memref<1x1920xf32, #tpu.memory_space<vmem>>, %arg8: memref<2x1024xf32, #tpu.memory_space<vmem>>, %arg9: memref<2x128xf32, #tpu.memory_space<vmem>>, %arg10: memref<2x128xf32, #tpu.memory_space<vmem>>) attributes {dimension_semantics = [], scalar_prefetch = 0 : i64, scratch_operands = 0 : i64, tpu.core_type = #tpu.core_type<tc>} {
    %c0 = arith.constant 0 : index
    %c0_0 = arith.constant 0 : index
    %0 = vector.load %arg0[%c0, %c0_0] : memref<2x1024xf32, #tpu.memory_space<vmem>>, vector<2x1024xf32>
    %1 = arith.truncf %0 : vector<2x1024xf32> to vector<2x1024xbf16>
    %c0_1 = arith.constant 0 : index
    %c0_2 = arith.constant 0 : index
    %2 = vector.load %arg3[%c0_1, %c0_2] : memref<1152x128xbf16, #tpu.memory_space<vmem>>, vector<1024x128xbf16>
    %cst = arith.constant dense<0.000000e+00> : vector<2x128xf32>
    %3 = tpu.matmul %1, %2, %cst {dimension_numbers = #tpu.dot_dimension_numbers<[1], [0], [0], [1], [0, 0, 1, 1], [], []>} : vector<2x1024xbf16>, vector<1024x128xbf16>, vector<2x128xf32> -> vector<2x128xf32>
    %c0_3 = arith.constant 0 : index
    %c0_4 = arith.constant 0 : index
    %4 = vector.load %arg7[%c0_3, %c0_4] : memref<1x1920xf32, #tpu.memory_space<vmem>>, vector<1x128xf32>
    %5 = vector.broadcast %4 : vector<1x128xf32> to vector<2x128xf32>
    %6 = arith.addf %3, %5 : vector<2x128xf32>
    %cst_5 = arith.constant 0.000000e+00 : f32
    %7 = vector.broadcast %cst_5 : f32 to vector<2x128xf32>
    %8 = arith.maximumf %6, %7 : vector<2x128xf32>
    %9 = arith.truncf %8 : vector<2x128xf32> to vector<2x128xbf16>
    %c0_6 = arith.constant 0 : index
    %c0_7 = arith.constant 0 : index
    %c0_8 = arith.constant 0 : index
    %10 = vector.load %arg4[%c0_6, %c0_7, %c0_8] : memref<2x128x64xbf16, #tpu.memory_space<vmem>>, vector<1x128x64xbf16>
    %11 = vector.shape_cast %10 : vector<1x128x64xbf16> to vector<128x64xbf16>
    %cst_9 = arith.constant dense<0.000000e+00> : vector<2x64xf32>
    %12 = tpu.matmul %9, %11, %cst_9 {dimension_numbers = #tpu.dot_dimension_numbers<[1], [0], [0], [1], [0, 0, 1, 1], [], []>} : vector<2x128xbf16>, vector<128x64xbf16>, vector<2x64xf32> -> vector<2x64xf32>
    %c0_10 = arith.constant 0 : index
    %c256 = arith.constant 256 : index
    %13 = vector.load %arg7[%c0_10, %c256] : memref<1x1920xf32, #tpu.memory_space<vmem>>, vector<1x64xf32>
    %14 = vector.broadcast %13 : vector<1x64xf32> to vector<2x64xf32>
    %15 = arith.addf %12, %14 : vector<2x64xf32>
    %c0_11 = arith.constant 0 : index
    %c0_12 = arith.constant 0 : index
    %16 = vector.load %arg1[%c0_11, %c0_12] : memref<2x128xf32, #tpu.memory_space<vmem>>, vector<2x128xf32>
    %17 = arith.truncf %16 : vector<2x128xf32> to vector<2x128xbf16>
    %c1024 = arith.constant 1024 : index
    %c0_13 = arith.constant 0 : index
    %18 = vector.load %arg3[%c1024, %c0_13] : memref<1152x128xbf16, #tpu.memory_space<vmem>>, vector<128x128xbf16>
    %cst_14 = arith.constant dense<0.000000e+00> : vector<2x128xf32>
    %19 = tpu.matmul %17, %18, %cst_14 {dimension_numbers = #tpu.dot_dimension_numbers<[1], [0], [0], [1], [0, 0, 1, 1], [], []>} : vector<2x128xbf16>, vector<128x128xbf16>, vector<2x128xf32> -> vector<2x128xf32>
    %c0_15 = arith.constant 0 : index
    %c128 = arith.constant 128 : index
    %20 = vector.load %arg7[%c0_15, %c128] : memref<1x1920xf32, #tpu.memory_space<vmem>>, vector<1x128xf32>
    %21 = vector.broadcast %20 : vector<1x128xf32> to vector<2x128xf32>
    %22 = arith.addf %19, %21 : vector<2x128xf32>
    %cst_16 = arith.constant 0.000000e+00 : f32
    %23 = vector.broadcast %cst_16 : f32 to vector<2x128xf32>
    %24 = arith.maximumf %22, %23 : vector<2x128xf32>
    %25 = arith.truncf %24 : vector<2x128xf32> to vector<2x128xbf16>
    %c1 = arith.constant 1 : index
    %c0_17 = arith.constant 0 : index
    %c0_18 = arith.constant 0 : index
    %26 = vector.load %arg4[%c1, %c0_17, %c0_18] : memref<2x128x64xbf16, #tpu.memory_space<vmem>>, vector<1x128x64xbf16>
    %27 = vector.shape_cast %26 : vector<1x128x64xbf16> to vector<128x64xbf16>
    %cst_19 = arith.constant dense<0.000000e+00> : vector<2x64xf32>
    %28 = tpu.matmul %25, %27, %cst_19 {dimension_numbers = #tpu.dot_dimension_numbers<[1], [0], [0], [1], [0, 0, 1, 1], [], []>} : vector<2x128xbf16>, vector<128x64xbf16>, vector<2x64xf32> -> vector<2x64xf32>
    %c0_20 = arith.constant 0 : index
    %c384 = arith.constant 384 : index
    %29 = vector.load %arg7[%c0_20, %c384] : memref<1x1920xf32, #tpu.memory_space<vmem>>, vector<1x64xf32>
    %30 = vector.broadcast %29 : vector<1x64xf32> to vector<2x64xf32>
    %31 = arith.addf %28, %30 : vector<2x64xf32>
    %32 = vector.extract_strided_slice %15 {offsets = [0, 0], sizes = [2, 32], strides = [1, 1]} : vector<2x64xf32> to vector<2x32xf32>
    %33 = vector.extract_strided_slice %15 {offsets = [0, 32], sizes = [2, 32], strides = [1, 1]} : vector<2x64xf32> to vector<2x32xf32>
    %34 = vector.extract_strided_slice %31 {offsets = [0, 0], sizes = [2, 32], strides = [1, 1]} : vector<2x64xf32> to vector<2x32xf32>
    %35 = vector.extract_strided_slice %31 {offsets = [0, 32], sizes = [2, 32], strides = [1, 1]} : vector<2x64xf32> to vector<2x32xf32>
    %36 = math.exp %33 : vector<2x32xf32>
    %cst_21 = arith.constant 2.000000e-08 : f32
    %37 = vector.broadcast %cst_21 : f32 to vector<2x32xf32>
    %38 = arith.addf %36, %37 : vector<2x32xf32>
    %39 = tpu.reciprocal %38 {approx = true} : vector<2x32xf32> -> vector<2x32xf32>
    %40 = math.exp %35 : vector<2x32xf32>
    %cst_22 = arith.constant 2.000000e-08 : f32
    %41 = vector.broadcast %cst_22 : f32 to vector<2x32xf32>
    %42 = arith.addf %40, %41 : vector<2x32xf32>
    %43 = tpu.reciprocal %42 {approx = true} : vector<2x32xf32> -> vector<2x32xf32>
    %cst_23 = arith.constant 1.000000e+00 : f32
    %44 = vector.broadcast %cst_23 : f32 to vector<2x32xf32>
    %45 = arith.addf %44, %39 : vector<2x32xf32>
    %46 = arith.addf %45, %43 : vector<2x32xf32>
    %47 = tpu.reciprocal %46 {approx = true} : vector<2x32xf32> -> vector<2x32xf32>
    %48 = arith.mulf %32, %39 : vector<2x32xf32>
    %49 = arith.mulf %34, %43 : vector<2x32xf32>
    %50 = arith.addf %48, %49 : vector<2x32xf32>
    %51 = arith.mulf %50, %47 : vector<2x32xf32>
    %cst_24 = arith.constant 9.99999993E-9 : f32
    %52 = vector.broadcast %cst_24 : f32 to vector<2x32xf32>
    %53 = arith.addf %47, %52 : vector<2x32xf32>
    %54 = math.log %53 : vector<2x32xf32>
    %c0_25 = arith.constant 0 : index
    %c0_26 = arith.constant 0 : index
    %55 = vector.load %arg10[%c0_25, %c0_26] : memref<2x128xf32, #tpu.memory_space<vmem>>, vector<2x32xf32>
    tpu.vector_store %arg10[%c0_25, %c0_26], %51 {strides = array<i32>} : memref<2x128xf32, #tpu.memory_space<vmem>>, vector<2x32xf32>,
    %c0_27 = arith.constant 0 : index
    %c32 = arith.constant 32 : index
    %56 = vector.load %arg10[%c0_27, %c32] : memref<2x128xf32, #tpu.memory_space<vmem>>, vector<2x32xf32>
    tpu.vector_store %arg10[%c0_27, %c32], %54 {strides = array<i32>} : memref<2x128xf32, #tpu.memory_space<vmem>>, vector<2x32xf32>,
    %c0_28 = arith.constant 0 : index
    %c0_29 = arith.constant 0 : index
    %57 = vector.load %arg2[%c0_28, %c0_29] : memref<2x32xf32, #tpu.memory_space<vmem>>, vector<2x32xf32>
    %cst_30 = arith.constant 5.000000e-01 : f32
    %58 = vector.broadcast %cst_30 : f32 to vector<2x32xf32>
    %59 = arith.mulf %58, %54 : vector<2x32xf32>
    %60 = math.exp %59 : vector<2x32xf32>
    %61 = arith.mulf %57, %60 : vector<2x32xf32>
    %62 = arith.addf %61, %51 : vector<2x32xf32>
    %63 = arith.truncf %62 : vector<2x32xf32> to vector<2x32xbf16>
    %c0_31 = arith.constant 0 : index
    %c0_32 = arith.constant 0 : index
    %64 = vector.load %arg5[%c0_31, %c0_32] : memref<32x256xbf16, #tpu.memory_space<vmem>>, vector<32x256xbf16>
    %cst_33 = arith.constant dense<0.000000e+00> : vector<2x256xf32>
    %65 = tpu.matmul %63, %64, %cst_33 {dimension_numbers = #tpu.dot_dimension_numbers<[1], [0], [0], [1], [0, 0, 1, 1], [], []>} : vector<2x32xbf16>, vector<32x256xbf16>, vector<2x256xf32> -> vector<2x256xf32>
    %c0_34 = arith.constant 0 : index
    %c512 = arith.constant 512 : index
    %66 = vector.load %arg7[%c0_34, %c512] : memref<1x1920xf32, #tpu.memory_space<vmem>>, vector<1x256xf32>
    %67 = vector.broadcast %66 : vector<1x256xf32> to vector<2x256xf32>
    %68 = arith.addf %65, %67 : vector<2x256xf32>
    %cst_35 = arith.constant 0.000000e+00 : f32
    %69 = vector.broadcast %cst_35 : f32 to vector<2x256xf32>
    %70 = arith.maximumf %68, %69 : vector<2x256xf32>
    %71 = vector.extract_strided_slice %70 {offsets = [0, 0], sizes = [2, 128], strides = [1, 1]} : vector<2x256xf32> to vector<2x128xf32>
    %72 = arith.truncf %71 : vector<2x128xf32> to vector<2x128xbf16>
    %73 = vector.extract_strided_slice %70 {offsets = [0, 128], sizes = [2, 128], strides = [1, 1]} : vector<2x256xf32> to vector<2x128xf32>
    %74 = arith.truncf %73 : vector<2x128xf32> to vector<2x128xbf16>
    %c0_36 = arith.constant 0 : index
    %c0_37 = arith.constant 0 : index
    %75 = vector.load %arg6[%c0_36, %c0_37] : memref<128x1152xbf16, #tpu.memory_space<vmem>>, vector<128x1024xbf16>
    %cst_38 = arith.constant dense<0.000000e+00> : vector<2x1024xf32>
    %76 = tpu.matmul %72, %75, %cst_38 {dimension_numbers = #tpu.dot_dimension_numbers<[1], [0], [0], [1], [0, 0, 1, 1], [], []>} : vector<2x128xbf16>, vector<128x1024xbf16>, vector<2x1024xf32> -> vector<2x1024xf32>
    %c0_39 = arith.constant 0 : index
    %c768 = arith.constant 768 : index
    %77 = vector.load %arg7[%c0_39, %c768] : memref<1x1920xf32, #tpu.memory_space<vmem>>, vector<1x1024xf32>
    %78 = vector.broadcast %77 : vector<1x1024xf32> to vector<2x1024xf32>
    %79 = arith.addf %76, %78 : vector<2x1024xf32>
    %80 = arith.negf %79 : vector<2x1024xf32>
    %81 = math.exp %80 : vector<2x1024xf32>
    %cst_40 = arith.constant 1.000000e+00 : f32
    %82 = vector.broadcast %cst_40 : f32 to vector<2x1024xf32>
    %83 = arith.addf %82, %81 : vector<2x1024xf32>
    %84 = arith.divf %82, %83 : vector<2x1024xf32>
    %c0_41 = arith.constant 0 : index
    %c0_42 = arith.constant 0 : index
    %85 = vector.load %arg8[%c0_41, %c0_42] : memref<2x1024xf32, #tpu.memory_space<vmem>>, vector<2x1024xf32>
    tpu.vector_store %arg8[%c0_41, %c0_42], %84 {strides = array<i32>} : memref<2x1024xf32, #tpu.memory_space<vmem>>, vector<2x1024xf32>,
    %c0_43 = arith.constant 0 : index
    %c1024_44 = arith.constant 1024 : index
    %86 = vector.load %arg6[%c0_43, %c1024_44] : memref<128x1152xbf16, #tpu.memory_space<vmem>>, vector<128x128xbf16>
    %cst_45 = arith.constant dense<0.000000e+00> : vector<2x128xf32>
    %87 = tpu.matmul %74, %86, %cst_45 {dimension_numbers = #tpu.dot_dimension_numbers<[1], [0], [0], [1], [0, 0, 1, 1], [], []>} : vector<2x128xbf16>, vector<128x128xbf16>, vector<2x128xf32> -> vector<2x128xf32>
    %c0_46 = arith.constant 0 : index
    %c1792 = arith.constant 1792 : index
    %88 = vector.load %arg7[%c0_46, %c1792] : memref<1x1920xf32, #tpu.memory_space<vmem>>, vector<1x128xf32>
    %89 = vector.broadcast %88 : vector<1x128xf32> to vector<2x128xf32>
    %90 = arith.addf %87, %89 : vector<2x128xf32>
    %c0_47 = arith.constant 0 : index
    %c0_48 = arith.constant 0 : index
    %91 = vector.load %arg9[%c0_47, %c0_48] : memref<2x128xf32, #tpu.memory_space<vmem>>, vector<2x128xf32>
    tpu.vector_store %arg9[%c0_47, %c0_48], %90 {strides = array<i32>} : memref<2x128xf32, #tpu.memory_space<vmem>>, vector<2x128xf32>,
    return
  }
}

</mosaic_0001>

<bundles_post_ra>
// kernel: multivae_forward.1
= control target key start
LH: loop header
LB: loop body
LE: loop exit
PB: predicated region body
PF: predicated region fallthrough
CT: control target
= control target key end

     0   :  { %16 = vsyncpa [#allocation3], 0  ;;  %s3179_s0 = inlined_call_operand.vmem [shape: f32[2,1024], index: 0, kind: input, shape index: {}]   ;;  %s3180_s1 = inlined_call_operand.vmem [shape: f32[2,128], index: 1, kind: input, shape index: {}]   ;;  %s3181_s2 = inlined_call_operand.vmem [shape: f32[2,32], index: 2, kind: input, shape index: {}]   ;;  %s3182_s3 = inlined_call_operand.hbm [shape: bf16[1152,128], index: 3, kind: input, shape index: {}]   ;;  %s3183_s4 = inlined_call_operand.vmem [shape: bf16[2,128,64], index: 4, kind: input, shape index: {}]   ;;  %s3184_s5 = inlined_call_operand.vmem [shape: bf16[32,256], index: 5, kind: input, shape index: {}]   ;;  %s3185_s6 = inlined_call_operand.hbm [shape: bf16[128,1152], index: 6, kind: input, shape index: {}]   ;;  %s3186_s7 = inlined_call_operand.vmem [shape: f32[1,1920], index: 7, kind: input, shape index: {}]   ;;  %s3187_s8 = inlined_call_operand.vmem [shape: f32[2,1024], index: 8, kind: output, shape index: {0}]   ;;  %s3188_s9 = inlined_call_operand.hbm [shape: f32[2,128], index: 9, kind: output, shape index: {1}]   ;;  %s3189_s10 = inlined_call_operand.vmem [shape: f32[2,128], index: 10, kind: output, shape index: {2}]  }
   0x1   :  { %17 = vsyncpa [#allocation6], 0 }
   0x2   :  { %18 = vsyncpa [#allocation4], 0  ;;  %s29_s15 = sshll.u32 %s3182_s3, 4  ;;  %s2852_s16 = smov [#allocation2]   ;;  %s30_s15 = int_to_ptr.hbm [resolvable:$true] %s29_s15 }
   0x3   :  { %s31_s17 = sshll.u32 %s2852_s16, 4  ;;  %s46_s20 = sshll.u32 %s3185_s6, 4  ;;  %s32_s17 = int_to_ptr.vmem [resolvable:$true] %s31_s17  ;;  %s47_s20 = int_to_ptr.hbm [resolvable:$true] %s46_s20 }
   0x4   :  { %s2853_s21 = smov 64   ;;  %s2854_s22 = smov 4  }
   0x5   :  { %37 = dma.hbm_to_vmem [thread:$0]  %s30_s15, 9216, %s32_s17, [#allocation3], %s2853_s21, %s2853_s21, %s2854_s22  }
   0x6   :  { %s2855_s23 = smov [#allocation5]   ;;  %s2856_s25 = smov 576  }
   0x7   :  { %s48_s24 = sshll.u32 %s2855_s23, 4  ;;  %s2857_s26 = smov 36   ;;  %s49_s24 = int_to_ptr.vmem [resolvable:$true] %s48_s24 }
   0x8   :  { %54 = dma.hbm_to_vmem [thread:$0]  %s47_s20, 9216, %s49_s24, [#allocation6], %s2856_s25, %s2856_s25, %s2857_s26  }
   0x9   :  { %2846 = dma.done.wait [#allocation3], 9216  }
   0xa   :  { %2847 = vsyncadd [#allocation3], 4294958080 }
   0xb   :  { %2848 = dma.done.wait [#allocation6], 9216  }
   0xc   :  { %2849 = vsyncadd [#allocation6], 4294958080  ;;  %v2566_v0 = vld [vmem:[#allocation2 + $0x78] sm:$0xff]  ;;  %v2565_v4 = vld [vmem:[#allocation2 + $0x70] sm:$0xff]  ;;  %s2858_s22 = smov 96   ;;  %vm997_vm0 = vcmask 254976  }
   0xd   :  { %v2574_v1 = vld [vmem:[#allocation2 + $0xb8] sm:$0xff]  ;;  %626 = vmatpush.bf16.msra.mxu1 %v2566_v0  ;;  %v2573_v5 = vld [vmem:[#allocation2 + $0xb0] sm:$0xff]  ;;  %v2564_v8 = vld [vmem:[#allocation2 + $0x68] sm:$0xff]  ;;  %vm999_vm1 = vcmask 517376   ;;  %vm1042_vm2 = vcmask 261120   ;;  %vm1748_vm10 = vcmask 1041408  }
   0xe   :  { %v2558_v2 = vld [vmem:[#allocation2 + $0x38] sm:$0xff]  ;;  %639 = vmatpush.bf16.msra.mxu2 %v2574_v1  ;;  %v2557_v6 = vld [vmem:[#allocation2 + $0x30] sm:$0xff]  ;;  %v2572_v9 = vld [vmem:[#allocation2 + $0xa8] sm:$0xff]  ;;  %vm1750_vm12 = vcmask 1045508   ;;  %s2859_s25 = smov [#allocation7]  }
   0xf   :  { %v2582_v3 = vld [vmem:[#allocation2 + $0xf8] sm:$0xff]  ;;  %613 = vmatpush.bf16.msra.mxu0 %v2558_v2  ;;  %v2581_v7 = vld [vmem:[#allocation2 + $0xf0] sm:$0xff]  ;;  %v2556_v10 = vld [vmem:[#allocation2 + $0x28] sm:$0xff]  ;;  %s3112_s26 = sshll.u32 %s2859_s25, 4  ;;  %s1851_s26 = int_to_ptr.vmem [resolvable:$true] %s3112_s26 }
  0x10   :  { %652 = vmatpush.bf16.msra.mxu3 %v2582_v3  ;;  %v2580_v11 = vld [vmem:[#allocation2 + $0xe8] sm:$0xff]  ;;  %v2563_v12 = vld [vmem:[#allocation2 + $0x60] sm:$0xff]  ;;  %v2562_v16 = vld [vmem:[#allocation2 + $0x58] sm:$0xff] }
  0x11   :  { %627 = vmatpush.bf16.msra.mxu1 %v2565_v4  ;;  %v2571_v13 = vld [vmem:[#allocation2 + $0xa0] sm:$0xff]  ;;  %v2570_v17 = vld [vmem:[#allocation2 + $0x98] sm:$0xff]  ;;  %v2561_v21 = vld [vmem:[#allocation2 + $0x50] sm:$0xff] }
  0x12   :  { %640 = vmatpush.bf16.msra.mxu2 %v2573_v5  ;;  %v2555_v14 = vld [vmem:[#allocation2 + $0x20] sm:$0xff]  ;;  %v2554_v18 = vld [vmem:[#allocation2 + $0x18] sm:$0xff]  ;;  %v2569_v22 = vld [vmem:[#allocation2 + $0x90] sm:$0xff] }
  0x13   :  { %614 = vmatpush.bf16.msra.mxu0 %v2557_v6  ;;  %v2579_v15 = vld [vmem:[#allocation2 + $0xe0] sm:$0xff]  ;;  %v2578_v19 = vld [vmem:[#allocation2 + $0xd8] sm:$0xff]  ;;  %v2553_v23 = vld [vmem:[#allocation2 + $0x10] sm:$0xff] }
  0x14   :  { %653 = vmatpush.bf16.msra.mxu3 %v2581_v7  ;;  %v66_v20 = vld [vmem:[%s3179_s0] sm:$0xff]  ;;  %v2577_v24 = vld [vmem:[#allocation2 + $0xd0] sm:$0xff]  ;;  %v67_v25 = vld [vmem:[%s3179_s0 + $0x8] sm:$0xff] }
  0x15   :  { %628 = vmatpush.bf16.msra.mxu1 %v2564_v8  ;;  %70 = vst [vmem:[#allocation1] ss:$4 sm:$0xff] %v66_v20  ;;  %v2560_v26 = vld [vmem:[#allocation2 + $0x48] sm:$0xff]  ;;  %v2559_v30 = vld [vmem:[#allocation2 + $0x40] sm:$0xff]  ;;  %v2598_v32 = vld [vmem:[#allocation2 + $0x178] sm:$0xff] }
  0x16   :  { %641 = vmatpush.bf16.msra.mxu2 %v2572_v9  ;;  %72 = vst [vmem:[#allocation1 + $0x20] ss:$4 sm:$0xff] %v67_v25  ;;  %v2568_v27 = vld [vmem:[#allocation2 + $0x88] sm:$0xff]  ;;  %v2567_v31 = vld [vmem:[#allocation2 + $0x80] sm:$0xff]  ;;  %v2606_v33 = vld [vmem:[#allocation2 + $0x1b8] sm:$0xff] }
  0x17   :  { %615 = vmatpush.bf16.msra.mxu0 %v2556_v10  ;;  %v2552_v28 = vld [vmem:[#allocation2 + $0x8] sm:$0xff]  ;;  %v2551_v34 = vld [vmem:[#allocation2] sm:$0xff]  ;;  %v2590_v38 = vld [vmem:[#allocation2 + $0x138] sm:$0xff] }
  0x18   :  { %654 = vmatpush.bf16.msra.mxu3 %v2580_v11  ;;  %v2576_v29 = vld [vmem:[#allocation2 + $0xc8] sm:$0xff]  ;;  %v2575_v37 = vld [vmem:[#allocation2 + $0xc0] sm:$0xff]  ;;  %v2614_v39 = vld [vmem:[#allocation2 + $0x1f8] sm:$0xff] }
  0x19   :  { %629 = vmatpush.bf16.msra.mxu1 %v2563_v12  ;;  %v2597_v44 = vld [vmem:[#allocation2 + $0x170] sm:$0xff]  ;;  %v2596_v50 = vld [vmem:[#allocation2 + $0x168] sm:$0xff]  ;;  %v2595_v54 = vld [vmem:[#allocation2 + $0x160] sm:$0xff] }
  0x1a   :  { %642 = vmatpush.bf16.msra.mxu2 %v2571_v13  ;;  %v2605_v45 = vld [vmem:[#allocation2 + $0x1b0] sm:$0xff]  ;;  %v2604_v51 = vld [vmem:[#allocation2 + $0x1a8] sm:$0xff]  ;;  %v2603_v55 = vld [vmem:[#allocation2 + $0x1a0] sm:$0xff] }
  0x1b   :  { %616 = vmatpush.bf16.msra.mxu0 %v2555_v14  ;;  %v2589_v48 = vld [vmem:[#allocation2 + $0x130] sm:$0xff]  ;;  %v2588_v52 = vld [vmem:[#allocation2 + $0x128] sm:$0xff]  ;;  %v2587_v56 = vld [vmem:[#allocation2 + $0x120] sm:$0xff] }
  0x1c   :  { %655 = vmatpush.bf16.msra.mxu3 %v2579_v15  ;;  %v75_v35 = vld.sshfl [vmem:[#allocation1 + $0x10] sm:$0xff pattern:$0x73625140]  ;;  %v74_v36 = vld.sshfl [vmem:[#allocation1 + $0x8] sm:$0xff pattern:$0x73625140] }
  0x1d   :  { %630 = vmatpush.bf16.msra.mxu1 %v2562_v16  ;;  %v73_v40 = vld.sshfl [vmem:[#allocation1] sm:$0xff pattern:$0x73625140]  ;;  %v76_v41 = vld.sshfl [vmem:[#allocation1 + $0x18] sm:$0xff pattern:$0x73625140]  ;;  %v91_v42 = vpack.c.bf16 %v75_v35, %v75_v35  ;;  %v90_v43 = vpack.c.bf16 %v74_v36, %v74_v36 }
  0x1e   :  { %643 = vmatpush.bf16.msra.mxu2 %v2570_v17  ;;  %v89_v46 = vpack.c.bf16 %v73_v40, %v73_v40  ;;  %v92_v47 = vpack.c.bf16 %v76_v41, %v76_v41  ;;  %v2613_v49 = vld [vmem:[#allocation2 + $0x1f0] sm:$0xff]  ;;  %v2612_v53 = vld [vmem:[#allocation2 + $0x1e8] sm:$0xff]  ;;  %v2611_v57 = vld [vmem:[#allocation2 + $0x1e0] sm:$0xff] }
  0x1f   :  { %617 = vmatpush.bf16.msra.mxu0 %v2554_v18  ;;  %v2594_v58 = vld [vmem:[#allocation2 + $0x158] sm:$0xff]  ;;  %v2593_v62 = vld [vmem:[#allocation2 + $0x150] sm:$0xff]  ;;  %v2592_v2 = vld [vmem:[#allocation2 + $0x148] sm:$0xff] }
  0x20   :  { %656 = vmatpush.bf16.msra.mxu3 %v2578_v19  ;;  %v2602_v59 = vld [vmem:[#allocation2 + $0x198] sm:$0xff]  ;;  %v2601_v63 = vld [vmem:[#allocation2 + $0x190] sm:$0xff]  ;;  %v2600_v3 = vld [vmem:[#allocation2 + $0x188] sm:$0xff] }
  0x21   :  { %631 = vmatpush.bf16.msra.mxu1 %v2561_v21  ;;  %v2586_v60 = vld [vmem:[#allocation2 + $0x118] sm:$0xff]  ;;  %v2585_v0 = vld [vmem:[#allocation2 + $0x110] sm:$0xff]  ;;  %v2584_v4 = vld [vmem:[#allocation2 + $0x108] sm:$0xff] }
  0x22   :  { %644 = vmatpush.bf16.msra.mxu2 %v2569_v22  ;;  %v2610_v61 = vld [vmem:[#allocation2 + $0x1d8] sm:$0xff]  ;;  %v2609_v1 = vld [vmem:[#allocation2 + $0x1d0] sm:$0xff]  ;;  %v2608_v5 = vld [vmem:[#allocation2 + $0x1c8] sm:$0xff] }
  0x23   :  { %618 = vmatpush.bf16.msra.mxu0 %v2553_v23  ;;  %v2591_v6 = vld [vmem:[#allocation2 + $0x140] sm:$0xff]  ;;  %v79_v8 = vld.sshfl [vmem:[#allocation1 + $0x30] sm:$0xff pattern:$0x73625140]  ;;  %v2630_v10 = vld [vmem:[#allocation2 + $0x238] sm:$0xff] }
  0x24   :  { %657 = vmatpush.bf16.msra.mxu3 %v2577_v24  ;;  %v2599_v7 = vld [vmem:[#allocation2 + $0x180] sm:$0xff]  ;;  %v77_v13 = vld.sshfl [vmem:[#allocation1 + $0x20] sm:$0xff pattern:$0x73625140]  ;;  %v95_v15 = vpack.c.bf16 %v79_v8, %v79_v8  ;;  %v2622_v19 = vld [vmem:[%s3183_s4 + $0x38] sm:$0xff] }
  0x25   :  { %632 = vmatpush.bf16.msra.mxu1 %v2560_v26  ;;  %v78_v9 = vld.sshfl [vmem:[#allocation1 + $0x28] sm:$0xff pattern:$0x73625140]  ;;  %v80_v14 = vld.sshfl [vmem:[#allocation1 + $0x38] sm:$0xff pattern:$0x73625140]  ;;  %v93_v17 = vpack.c.bf16 %v77_v13, %v77_v13 }
  0x26   :  { %645 = vmatpush.bf16.msra.mxu2 %v2568_v27  ;;  %v2583_v11 = vld [vmem:[#allocation2 + $0x100] sm:$0xff]  ;;  %v94_v16 = vpack.c.bf16 %v78_v9, %v78_v9  ;;  %v96_v18 = vpack.c.bf16 %v80_v14, %v80_v14  ;;  %v2629_v20 = vld [vmem:[#allocation2 + $0x230] sm:$0xff]  ;;  %v2628_v21 = vld [vmem:[#allocation2 + $0x228] sm:$0xff] }
  0x27   :  { %619 = vmatpush.bf16.msra.mxu0 %v2552_v28  ;;  %v2607_v12 = vld [vmem:[#allocation2 + $0x1c0] sm:$0xff]  ;;  %v2626_v23 = vld [vmem:[#allocation2 + $0x218] sm:$0xff]  ;;  %v2625_v24 = vld [vmem:[#allocation2 + $0x210] sm:$0xff] }
  0x28   :  { %658 = vmatpush.bf16.msra.mxu3 %v2576_v29  ;;  %v2627_v22 = vld [vmem:[#allocation2 + $0x220] sm:$0xff]  ;;  %v2624_v25 = vld [vmem:[#allocation2 + $0x208] sm:$0xff]  ;;  %v800_v27 = vld [vmem:[%s3180_s1] sm:$0x3] }
  0x29   :  { %633 = vmatpush.bf16.msra.mxu1 %v2559_v30  ;;  %v2623_v26 = vld [vmem:[#allocation2 + $0x200] sm:$0xff]  ;;  %v801_v28 = vpack.c.bf16 %v800_v27, %v800_v27  ;;  %v2621_v29 = vld [vmem:[%s3183_s4 + $0x30] sm:$0xff]  ;;  %v2638_v35 = vld [vmem:[%s3183_s4 + $0x78] sm:$0xff] }
  0x2a   :  { %646 = vmatpush.bf16.msra.mxu2 %v2567_v31  ;;  %v2620_v30 = vld [vmem:[%s3183_s4 + $0x28] sm:$0xff]  ;;  %v2619_v31 = vld [vmem:[%s3183_s4 + $0x20] sm:$0xff] }
  0x2b   :  { %620 = vmatpush.bf16.msra.mxu0 %v2551_v34  ;;  %v2615_v40 = vld [vmem:[%s3183_s4] sm:$0xff] }
  0x2c   :  { %659 = vmatpush.bf16.msra.mxu3 %v2575_v37  ;;  %634 = vmatmul.bf16.vlgmr.msra.gmra.mxu1 %v90_v43  ;;  %v2616_v37 = vld [vmem:[%s3183_s4 + $0x8] sm:$0xff]  ;;  %v2725_v13 = vld [vmem:[%s3186_s7 + $0x2] ss:$0 sm:$0xff] }
  0x2d   :  { %678 = vmatpush.bf16.msrb.mxu1 %v2598_v32  ;;  %647 = vmatmul.bf16.vlgmr.msra.gmra.mxu2 %v91_v42  ;;  %v2618_v32 = vld [vmem:[%s3183_s4 + $0x18] sm:$0xff]  ;;  %v2636_v43 = vld [vmem:[%s3183_s4 + $0x68] sm:$0xff] }
  0x2e   :  { %691 = vmatpush.bf16.msrb.mxu2 %v2606_v33  ;;  %621 = vmatmul.bf16.vlgmr.msra.gmra.mxu0 %v89_v46  ;;  %v2617_v33 = vld [vmem:[%s3183_s4 + $0x10] sm:$0xff]  ;;  %v2635_v46 = vld [vmem:[%s3183_s4 + $0x60] sm:$0xff] }
  0x2f   :  { %665 = vmatpush.bf16.msrb.mxu0 %v2590_v38  ;;  %660 = vmatmul.bf16.vlgmr.msra.gmra.mxu3 %v92_v47  ;;  %v2637_v38 = vld [vmem:[%s3183_s4 + $0x70] sm:$0xff] }
  0x30   :  { %704 = vmatpush.bf16.msrb.mxu3 %v2614_v39 }
  0x31   :  { %679 = vmatpush.bf16.msrb.mxu1 %v2597_v44 }
  0x32   :  { %692 = vmatpush.bf16.msrb.mxu2 %v2605_v45  ;;  %v2723_v45 = vld [vmem:[%s3186_s7] ss:$0 sm:$0xff] }
  0x33   :  { %666 = vmatpush.bf16.msrb.mxu0 %v2589_v48  ;;  %v2634_v48 = vld [vmem:[%s3183_s4 + $0x58] sm:$0xff] }
  0x34   :  { %705 = vmatpush.bf16.msrb.mxu3 %v2613_v49 }
  0x35   :  { %680 = vmatpush.bf16.msrb.mxu1 %v2596_v50 }
  0x36   :  { %693 = vmatpush.bf16.msrb.mxu2 %v2604_v51  ;;  %v2633_v51 = vld [vmem:[%s3183_s4 + $0x50] sm:$0xff] }
  0x37   :  { %667 = vmatpush.bf16.msrb.mxu0 %v2588_v52 }
  0x38   :  { %706 = vmatpush.bf16.msrb.mxu3 %v2612_v53 }
  0x39   :  { %681 = vmatpush.bf16.msrb.mxu1 %v2595_v54  ;;  %v2632_v54 = vld [vmem:[%s3183_s4 + $0x48] sm:$0xff] }
  0x3a   :  { %694 = vmatpush.bf16.msrb.mxu2 %v2603_v55 }
  0x3b   :  { %668 = vmatpush.bf16.msrb.mxu0 %v2587_v56 }
  0x3c   :  { %707 = vmatpush.bf16.msrb.mxu3 %v2611_v57  ;;  %v2631_v57 = vld [vmem:[%s3183_s4 + $0x40] sm:$0xff] }
  0x3d   :  { %682 = vmatpush.bf16.msrb.mxu1 %v2594_v58 }
  0x3e   :  { %695 = vmatpush.bf16.msrb.mxu2 %v2602_v59 }
  0x3f   :  { %669 = vmatpush.bf16.msrb.mxu0 %v2586_v60 }
  0x40   :  { %708 = vmatpush.bf16.msrb.mxu3 %v2610_v61 }
  0x41   :  { %683 = vmatpush.bf16.msrb.mxu1 %v2593_v62 }
  0x42   :  { %696 = vmatpush.bf16.msrb.mxu2 %v2601_v63 }
  0x43   :  { %670 = vmatpush.bf16.msrb.mxu0 %v2585_v0 }
  0x44   :  { %709 = vmatpush.bf16.msrb.mxu3 %v2609_v1 }
  0x45   :  { %684 = vmatpush.bf16.msrb.mxu1 %v2592_v2 }
  0x46   :  { %697 = vmatpush.bf16.msrb.mxu2 %v2600_v3 }
  0x47   :  { %671 = vmatpush.bf16.msrb.mxu0 %v2584_v4 }
  0x48   :  { %710 = vmatpush.bf16.msrb.mxu3 %v2608_v5 }
  0x49   :  { %685 = vmatpush.bf16.msrb.mxu1 %v2591_v6 }
  0x4a   :  { %698 = vmatpush.bf16.msrb.mxu2 %v2599_v7  ;;  %v2724_v7 = vld [vmem:[%s3186_s7 + $0x1] ss:$0 sm:$0xff] }
  0x4b   :  { %672 = vmatpush.bf16.msrb.mxu0 %v2583_v11 }
  0x4c   :  { %711 = vmatpush.bf16.msrb.mxu3 %v2607_v12  ;;  %686 = vmatmul.bf16.vlgmr.msrb.gmra.mxu1 %v94_v16 }
  0x4d   :  { %870 = vmatpush.bf16.msra.mxu1 %v2630_v10  ;;  %699 = vmatmul.bf16.vlgmr.msrb.gmra.mxu2 %v95_v15 }
  0x4e   :  { %673 = vmatmul.bf16.vlgmr.msrb.gmra.mxu0 %v93_v17  ;;  %954 = vmatpush.bf16.msra.mxu2 %v2638_v35 }
  0x4f   :  { %787 = vmatpush.bf16.msra.mxu0 %v2622_v19  ;;  %712 = vmatmul.bf16.vlgmr.msrb.gmra.mxu3 %v96_v18 }
  0x51   :  { %871 = vmatpush.bf16.msra.mxu1 %v2629_v20 }
  0x52   :  { %955 = vmatpush.bf16.msra.mxu2 %v2637_v38  ;;  %v2247_v38 = vld [vmem:[%s3184_s5 + $0x10] sm:$0xf] }
  0x53   :  { %788 = vmatpush.bf16.msra.mxu0 %v2621_v29 }
  0x55   :  { %872 = vmatpush.bf16.msra.mxu1 %v2628_v21  ;;  %v2726_v21 = vld [vmem:[%s3186_s7 + $0x3] ss:$0 sm:$0xff] }
  0x56   :  { %956 = vmatpush.bf16.msra.mxu2 %v2636_v43 }
  0x57   :  { %789 = vmatpush.bf16.msra.mxu0 %v2620_v30 }
  0x59   :  { %873 = vmatpush.bf16.msra.mxu1 %v2627_v22 }
  0x5a   :  { %957 = vmatpush.bf16.msra.mxu2 %v2635_v46 }
  0x5b   :  { %790 = vmatpush.bf16.msra.mxu0 %v2619_v31 }
  0x5d   :  { %874 = vmatpush.bf16.msra.mxu1 %v2626_v23 }
  0x5e   :  { %958 = vmatpush.bf16.msra.mxu2 %v2634_v48  ;;  %v2641_v48 = vld [vmem:[%s3184_s5 + $0x14] sm:$0xf] }
  0x5f   :  { %791 = vmatpush.bf16.msra.mxu0 %v2618_v32 }
  0x61   :  { %875 = vmatpush.bf16.msra.mxu1 %v2625_v24 }
  0x62   :  { %959 = vmatpush.bf16.msra.mxu2 %v2633_v51 }
  0x63   :  { %792 = vmatpush.bf16.msra.mxu0 %v2617_v33 }
  0x65   :  { %876 = vmatpush.bf16.msra.mxu1 %v2624_v25 }
  0x66   :  { %960 = vmatpush.bf16.msra.mxu2 %v2632_v54 }
  0x67   :  { %793 = vmatpush.bf16.msra.mxu0 %v2616_v37 }
  0x69   :  { %877 = vmatpush.bf16.msra.mxu1 %v2623_v26 }
  0x6a   :  { %961 = vmatpush.bf16.msra.mxu2 %v2631_v57  ;;  %v2481_v57 = vld [vmem:[#allocation5 + $0x1f8] sm:$0xf] }
  0x6b   :  { %794 = vmatpush.bf16.msra.mxu0 %v2615_v40  ;;  %v2239_v40 = vld [vmem:[%s3184_s5] sm:$0xf] }
  0x6c   :  { %878 = vmatmul.bf16.vlgmr.msra.gmra.mxu1 %v801_v28 }
  0xa9   :  { %v635_v34 = vpop.f32.mrf.mxu1 }
  0xab   :  { %v622_v36 = vpop.f32.mrf.mxu0 }
  0xac   :  { %v623_v49 = vadd.f32 %v2723_v45, %v622_v36 }
  0xae   :  { %v636_v52 = vadd.f32 %v635_v34, %v623_v49  ;;  %v2249_v49 = vld [vmem:[%s3184_s5 + $0x18] sm:$0xf0] }
  0xaf   :  { %v2252_v51 = vor.u32 %v2641_v48, %v2249_v49  ;;  %v2684_v49 = vld [vmem:[#allocation5 + $0x174] sm:$0xf] }
  0xb0   :  { %v648_v39 = vpop.f32.mrf.mxu2 }
  0xb1   :  { %v637_v42 = vpop.f32.mrf.mxu1  ;;  %v649_v53 = vadd.f32 %v648_v39, %v636_v52  ;;  %v2642_v39 = vld [vmem:[%s3184_s5 + $0x14] sm:$0xf0]  ;;  %v2241_v52 = vld [vmem:[%s3184_s5 + $0x8] sm:$0xf0] }
  0xb2   :  { %v661_v41 = vpop.f32.mrf.mxu3  ;;  %v2640_v42 = vld [vmem:[%s3184_s5 + $0x4] sm:$0xf0] }
  0xb3   :  { %v624_v44 = vpop.f32.mrf.mxu0  ;;  %v662_v55 = vadd.f32 %v661_v41, %v649_v53  ;;  %v2248_v41 = vor.u32 %v2642_v39, %v2247_v38  ;;  %v2240_v43 = vor.u32 %v2640_v42, %v2239_v40  ;;  %v2459_v38 = vld [vmem:[#allocation5 + $0x1dc] sm:$0xf0] }
  0xb5   :  { %1052 = vmatpush.bf16.msra.mxu3 %v2248_v41  ;;  %v2667_v41 = vld [vmem:[#allocation5 + $0xdc] sm:$0xf] }
  0xb8   :  { %v650_v47 = vpop.f32.mrf.mxu2 }
  0xb9   :  { %1053 = vmatpush.bf16.msra.mxu3 %v2240_v43  ;;  %v2355_v43 = vld [vmem:[#allocation5 + $0xfc] sm:$0xf0] }
  0xba   :  { %v663_v50 = vpop.f32.mrf.mxu3 }
  0xbb   :  { %v2639_v50 = vld [vmem:[%s3184_s5 + $0x4] sm:$0xf] }
  0xbd   :  { %1065 = vmatpush.bf16.msrb.mxu3 %v2252_v51  ;;  %v2358_v51 = vor.u32 %v2667_v41, %v2355_v43  ;;  %v2433_v41 = vld [vmem:[#allocation5 + $0x178] sm:$0xf]  ;;  %v2652_v43 = vld [vmem:[#allocation5 + $0x54] sm:$0xf] }
  0xc9   :  { %v687_v56 = vpop.f32.mrf.mxu1 }
  0xcb   :  { %v674_v58 = vpop.f32.mrf.mxu0 }
  0xcc   :  { %v675_v59 = vadd.f32 %v674_v58, %v662_v55  ;;  %v2244_v55 = vor.u32 %v2639_v50, %v2241_v52  ;;  %v2703_v58 = vld [vmem:[#allocation5 + $0x218] sm:$0xf0]  ;;  %v2427_v50 = vld [vmem:[#allocation5 + $0x194] sm:$0xf0] }
  0xce   :  { %v688_v60 = vadd.f32 %v687_v56, %v675_v59  ;;  %1066 = vmatpush.bf16.msrb.mxu3 %v2244_v55  ;;  %v2449_v59 = vld [vmem:[#allocation5 + $0x1b0] sm:$0xf]  ;;  %v2323_v55 = vld [vmem:[#allocation5 + $0xb4] sm:$0xf0] }
  0xd0   :  { %v700_v61 = vpop.f32.mrf.mxu2 }
  0xd1   :  { %v701_v62 = vadd.f32 %v700_v61, %v688_v60  ;;  %v689_v0 = vpop.f32.mrf.mxu1  ;;  %v2482_v60 = vor.u32 %v2703_v58, %v2481_v57  ;;  %v2695_v61 = vld [vmem:[#allocation5 + $0x1d0] sm:$0xf0]  ;;  %v2664_v57 = vld [vmem:[#allocation5 + $0xb8] sm:$0xf0]  ;;  %v2289_v58 = vld [vmem:[#allocation5 + $0x48] sm:$0xf] }
  0xd2   :  { %v713_v63 = vpop.f32.mrf.mxu3  ;;  %v2483_v0 = vld [vmem:[#allocation5 + $0x21c] sm:$0xf0] }
  0xd3   :  { %v714_v1 = vadd.f32 %v713_v63, %v701_v62  ;;  %v676_v2 = vpop.f32.mrf.mxu0  ;;  %v2699_v62 = vld [vmem:[#allocation5 + $0x1fc] sm:$0xf]  ;;  %1478 = vmatpush.bf16.msrb.mxu0 %v2482_v60  ;;  %v2450_v63 = vor.u32 %v2695_v61, %v2449_v59  ;;  %v2655_v59 = vld [vmem:[#allocation5 + $0x68] sm:$0xf0]  ;;  %v2430_v60 = vor.u32 %v2684_v49, %v2427_v50  ;;  %v2681_v49 = vld [vmem:[#allocation5 + $0x150] sm:$0xf0] }
  0xd4   :  { %v2704_v2 = vld [vmem:[#allocation5 + $0x220] sm:$0xf0]  ;;  %v2676_v61 = vld [vmem:[#allocation5 + $0x12c] sm:$0xf] }
  0xd5   :  { %v717_v3 = vmax.f32 %v714_v1, 0.0  ;;  %v2489_v1 = vld [vmem:[#allocation5 + $0x200] sm:$0xf]  ;;  %v2644_v50 = vld [vmem:[#allocation5 + $0xc] sm:$0xf] }
  0xd7   :  { %v718_v4 = vpack.c.bf16 %v717_v3, %v717_v3  ;;  %v2417_v3 = vld [vmem:[#allocation5 + $0x168] sm:$0xf]  ;;  %1479 = vmatpush.bf16.msrb.mxu0 %v2450_v63 }
  0xd8   :  { %v702_v5 = vpop.f32.mrf.mxu2 }
  0xd9   :  { %795 = vmatmul.bf16.vlgmr.msra.gmra.mxu0 %v718_v4  ;;  %v2687_v4 = vld [vmem:[#allocation5 + $0x188] sm:$0xf0]  ;;  %v2486_v5 = vor.u32 %v2699_v62, %v2483_v0  ;;  %v2395_v62 = vld [vmem:[#allocation5 + $0x14c] sm:$0xf0] }
  0xda   :  { %v715_v6 = vpop.f32.mrf.mxu3 }
  0xdb   :  { %v2490_v6 = vor.u32 %v2704_v2, %v2489_v1  ;;  %1491 = vmatpush.bf16.msrb.mxu1 %v2486_v5  ;;  %v2651_v1 = vld [vmem:[#allocation5 + $0x4c] sm:$0xf]  ;;  %v2290_v2 = vor.u32 %v2655_v59, %v2289_v58  ;;  %v2656_v5 = vld [vmem:[#allocation5 + $0x70] sm:$0xf0] }
  0xdc   :  { %v2694_v59 = vld [vmem:[#allocation5 + $0x1cc] sm:$0xf] }
  0xdd   :  { %1504 = vmatpush.bf16.msrb.mxu2 %v2490_v6  ;;  %v2257_v6 = vld [vmem:[#allocation5] sm:$0xf] }
  0xe9   :  { %v879_v8 = vpop.f32.mrf.mxu1 }
  0xea   :  { %v880_v9 = vadd.f32 %v2724_v7, %v879_v8  ;;  %v2691_v7 = vld [vmem:[#allocation5 + $0x1b4] sm:$0xf]  ;;  %v2451_v8 = vld [vmem:[#allocation5 + $0x1d4] sm:$0xf0] }
  0xec   :  { %v883_v10 = vmax.f32 %v880_v9, 0.0  ;;  %v2454_v9 = vor.u32 %v2691_v7, %v2451_v8  ;;  %v2647_v7 = vld [vmem:[#allocation5 + $0x20] sm:$0xf0]  ;;  %v2398_v8 = vor.u32 %v2676_v61, %v2395_v62  ;;  %v2337_v62 = vld [vmem:[#allocation5 + $0xa0] sm:$0xf] }
  0xee   :  { %v884_v11 = vpack.c.bf16 %v883_v10, %v883_v10  ;;  %v2457_v10 = vld [vmem:[#allocation5 + $0x1b8] sm:$0xf]  ;;  %1492 = vmatpush.bf16.msrb.mxu1 %v2454_v9  ;;  %v2668_v9 = vld [vmem:[#allocation5 + $0xe4] sm:$0xf] }
  0xf0   :  { %962 = vmatmul.bf16.vlgmr.msra.gmra.mxu2 %v884_v11  ;;  %v2696_v11 = vld [vmem:[#allocation5 + $0x1d8] sm:$0xf0] }
  0xf1   :  { %v881_v12 = vpop.f32.mrf.mxu1 }
  0xf2   :  { %v1001_v12 = vld [vmem:[%s3181_s2] sm:$0x3] }
 0x156   :  { %v796_v14 = vpop.f32.mrf.mxu0 }
 0x157   :  { %v797_v15 = vadd.f32 %v2725_v13, %v796_v14  ;;  %v2418_v13 = vor.u32 %v2687_v4, %v2417_v3  ;;  %v2385_v14 = vld [vmem:[#allocation5 + $0x120] sm:$0xf]  ;;  %v2291_v3 = vld [vmem:[#allocation5 + $0x6c] sm:$0xf0] }
 0x158   :  { %v2297_v4 = vld [vmem:[#allocation5 + $0x50] sm:$0xf] }
 0x159   :  { %v967_v16 = vmul.f32 1.442695, %v797_v15  ;;  %1480 = vmatpush.bf16.msrb.mxu0 %v2418_v13  ;;  %v2294_v13 = vor.u32 %v2651_v1, %v2291_v3  ;;  %v2435_v3 = vld [vmem:[#allocation5 + $0x19c] sm:$0xf0] }
 0x15b   :  { %2728 = vpow2.f32 %v967_v16  ;;  %v2458_v16 = vor.u32 %v2696_v11, %v2457_v10  ;;  %v2497_v10 = vld [vmem:[#allocation5 + $0x208] sm:$0xf]  ;;  %v2705_v11 = vld [vmem:[#allocation5 + $0x228] sm:$0xf0] }
 0x15d   :  { %1505 = vmatpush.bf16.msrb.mxu2 %v2458_v16  ;;  %v2259_v16 = vld [vmem:[#allocation5 + $0x24] sm:$0xf0] }
 0x15e   :  { %v798_v17 = vpop.f32.mrf.mxu0 }
 0x15f   :  { %v2683_v17 = vld [vmem:[#allocation5 + $0x16c] sm:$0xf] }
 0x161   :  { %v2729_v18 = vpop.eup %2728 }
 0x162   :  { %v969_v19 = vadd.f32 2e-08, %v2729_v18  ;;  %v2419_v18 = vld [vmem:[#allocation5 + $0x18c] sm:$0xf0] }
 0x164   :  { %2730 = vrcp.f32 %v969_v19  ;;  %v2425_v19 = vld [vmem:[#allocation5 + $0x170] sm:$0xf] }
 0x16a   :  { %v2731_v20 = vpop.eup %2730 }
 0x16b   :  { %979 = vrot.lane.b32.xlu0 %v2731_v20, %s2858_s22  ;;  %v975_v28 = vadd.f32 1.0, %v2731_v20 }
 0x173   :  { %v963_v22 = vpop.f32.mrf.mxu2 }
 0x174   :  { %v964_v23 = vadd.f32 %v2726_v21, %v963_v22  ;;  %v2688_v21 = vld [vmem:[#allocation5 + $0x190] sm:$0xf0] }
 0x176   :  { %v971_v24 = vmul.f32 1.442695, %v964_v23 }
 0x178   :  { %2732 = vpow2.f32 %v971_v24  ;;  %v2491_v24 = vld [vmem:[#allocation5 + $0x224] sm:$0xf0] }
 0x17b   :  { %v965_v25 = vpop.f32.mrf.mxu2 }
 0x17c   :  { %v2422_v25 = vor.u32 %v2683_v17, %v2419_v18  ;;  %v2258_v17 = vor.u32 %v2647_v7, %v2257_v6  ;;  %v2265_v18 = vld [vmem:[#allocation5 + $0x8] sm:$0xf]  ;;  %v2690_v6 = vld [vmem:[#allocation5 + $0x1a0] sm:$0xf0] }
 0x17d   :  { %v2686_v7 = vld [vmem:[#allocation5 + $0x184] sm:$0xf] }
 0x17e   :  { %v2733_v26 = vpop.eup %2732  ;;  %1493 = vmatpush.bf16.msrb.mxu1 %v2422_v25 }
 0x17f   :  { %v973_v27 = vadd.f32 2e-08, %v2733_v26  ;;  %v2426_v26 = vor.u32 %v2688_v21, %v2425_v19  ;;  %v2648_v19 = vld [vmem:[#allocation5 + $0x28] sm:$0xf0]  ;;  %v2498_v21 = vor.u32 %v2705_v11, %v2497_v10  ;;  %v2305_v11 = vld [vmem:[#allocation5 + $0x58] sm:$0xf] }
 0x181   :  { %2734 = vrcp.f32 %v973_v27  ;;  %v2675_v27 = vld [vmem:[#allocation5 + $0x124] sm:$0xf]  ;;  %1506 = vmatpush.bf16.msrb.mxu2 %v2426_v26  ;;  %v2465_v26 = vld [vmem:[#allocation5 + $0x1c0] sm:$0xf] }
 0x187   :  { %v2735_v29 = vpop.eup %2734 }
 0x188   :  { %984 = vrot.lane.b32.xlu0 %v2735_v29, %s2858_s22  ;;  %v976_v30 = vadd.f32 %v2735_v29, %v975_v28  ;;  %v2387_v29 = vld [vmem:[#allocation5 + $0x144] sm:$0xf0] }
 0x189   :  { %v2390_v39 = vor.u32 %v2675_v27, %v2387_v29  ;;  %v2697_v27 = vld [vmem:[#allocation5 + $0x1e0] sm:$0xf0]  ;;  %v2331_v29 = vld [vmem:[#allocation5 + $0xbc] sm:$0xf0] }
 0x18a   :  { %2736 = vrcp.f32 %v976_v30  ;;  %v2393_v30 = vld [vmem:[#allocation5 + $0x128] sm:$0xf] }
 0x18b   :  { %1494 = vmatpush.bf16.msrb.mxu1 %v2390_v39  ;;  %v2698_v39 = vld [vmem:[#allocation5 + $0x1e8] sm:$0xf0] }
 0x18f   :  { %1495 = vmatpush.bf16.msrb.mxu1 %v2358_v51  ;;  %v2267_v51 = vld [vmem:[#allocation5 + $0x2c] sm:$0xf0] }
 0x190   :  { %v2737_v31 = vpop.eup %2736 }
 0x191   :  { %990 = vrot.lane.b32.xlu1 %v2737_v31, %s2858_s22  ;;  %v994_v32 = vadd.f32 1e-08, %v2737_v31  ;;  %v2680_v31 = vld [vmem:[#allocation5 + $0x148] sm:$0xf0] }
 0x192   :  { %v2394_v40 = vor.u32 %v2680_v31, %v2393_v30  ;;  %v2266_v31 = vor.u32 %v2648_v19, %v2265_v18  ;;  %v2682_v18 = vld [vmem:[#allocation5 + $0x158] sm:$0xf0] }
 0x193   :  { %2738 = vlog2.f32 %v994_v32  ;;  %v2678_v19 = vld [vmem:[#allocation5 + $0x13c] sm:$0xf] }
 0x194   :  { %1507 = vmatpush.bf16.msrb.mxu2 %v2394_v40 }
 0x199   :  { %v2739_v33 = vpop.eup %2738 }
 0x19a   :  { %v996_v34 = vmul.f32 0.6931472, %v2739_v33  ;;  %v2353_v33 = vld [vmem:[#allocation5 + $0xd8] sm:$0xf] }
 0x19c   :  { %v1002_v35 = vmul.f32 0.5, %v996_v34 }
 0x19e   :  { %v1003_v36 = vmul.f32 1.442695, %v1002_v35 }
 0x1a0   :  { %2740 = vpow2.f32 %v1003_v36 }
 0x1a6   :  { %v2741_v37 = vpop.eup %2740 }
 0x1a7   :  { %1006 = vrot.lane.b32.xlu1 %v2741_v37, %s2858_s22  ;;  %v2692_v37 = vld [vmem:[#allocation5 + $0x1bc] sm:$0xf] }
 0x1a8   :  { %v2462_v48 = vor.u32 %v2692_v37, %v2459_v38  ;;  %v2467_v37 = vld [vmem:[#allocation5 + $0x1e4] sm:$0xf0] }
 0x1a9   :  { %v2473_v38 = vld [vmem:[#allocation5 + $0x1c8] sm:$0xf] }
 0x1dd   :  { %v980_v44 = vpop.permute.xlu0 %979 }
 0x1de   :  { %v982_v47 = vmul.f32 %v980_v44, %v797_v15  ;;  %v2679_v15 = vld [vmem:[#allocation5 + $0x140] sm:$0xf0]  ;;  %v2361_v44 = vld [vmem:[#allocation5 + $0xe0] sm:$0xf] }
 0x1df   :  { %v2386_v28 = vor.u32 %v2679_v15, %v2385_v14  ;;  %v2298_v14 = vor.u32 %v2656_v5, %v2297_v4  ;;  %v2643_v15 = vld [vmem:[#allocation5 + $0x4] sm:$0xf]  ;;  %v2441_v4 = vld [vmem:[#allocation5 + $0x180] sm:$0xf] }
 0x1e0   :  { %v2262_v30 = vor.u32 %v2643_v15, %v2259_v16  ;;  %v2403_v15 = vld [vmem:[#allocation5 + $0x154] sm:$0xf0] }
 0x1e1   :  { %1481 = vmatpush.bf16.msrb.mxu0 %v2386_v28  ;;  %v2660_v28 = vld [vmem:[#allocation5 + $0x9c] sm:$0xf]  ;;  %v2409_v16 = vld [vmem:[#allocation5 + $0x138] sm:$0xf] }
 0x1e2   :  { %v2334_v40 = vor.u32 %v2660_v28, %v2331_v29  ;;  %v2377_v28 = vld [vmem:[#allocation5 + $0xf0] sm:$0xf] }
 0x1fa   :  { %v985_v45 = vpop.permute.xlu0 %984 }
 0x1fb   :  { %v987_v46 = vmul.f32 %v985_v45, %v964_v23  ;;  %v2700_v23 = vld [vmem:[#allocation5 + $0x204] sm:$0xf] }
 0x1fc   :  { %v2494_v35 = vor.u32 %v2700_v23, %v2491_v24  ;;  %v2672_v45 = vld [vmem:[#allocation5 + $0x100] sm:$0xf0]  ;;  %v2505_v23 = vld [vmem:[#allocation5 + $0x210] sm:$0xf]  ;;  %v2706_v24 = vld [vmem:[#allocation5 + $0x230] sm:$0xf0] }
 0x1fd   :  { %v988_v53 = vadd.f32 %v987_v46, %v982_v47  ;;  %v2321_v46 = vld [vmem:[#allocation5 + $0x90] sm:$0xf]  ;;  %v2663_v47 = vld [vmem:[#allocation5 + $0xb0] sm:$0xf0]  ;;  %v2362_v52 = vor.u32 %v2672_v45, %v2361_v44  ;;  %v2299_v44 = vld [vmem:[#allocation5 + $0x74] sm:$0xf0] }
 0x1ff   :  { %1508 = vmatpush.bf16.msrb.mxu2 %v2362_v52  ;;  %v2702_v52 = vld [vmem:[#allocation5 + $0x214] sm:$0xf] }
 0x203   :  { %v991_v54 = vpop.permute.xlu1 %990 }
 0x204   :  { %v993_v56 = vmul.f32 %v991_v54, %v988_v53  ;;  %v2659_v53 = vld [vmem:[#allocation5 + $0x94] sm:$0xf]  ;;  %v2322_v54 = vor.u32 %v2663_v47, %v2321_v46  ;;  %v2474_v46 = vor.u32 %v2698_v39, %v2473_v38  ;;  %v2345_v38 = vld [vmem:[#allocation5 + $0xa8] sm:$0xf] }
 0x205   :  { %v2326_v63 = vor.u32 %v2659_v53, %v2323_v55  ;;  %v2507_v53 = vld [vmem:[#allocation5 + $0x234] sm:$0xf0]  ;;  %v2270_v55 = vor.u32 %v2644_v50, %v2267_v51  ;;  %v2315_v50 = vld [vmem:[#allocation5 + $0x84] sm:$0xf0] }
 0x206   :  { %998 = vst.msk [vmem:[%s3189_s10] sm:$0x3] %vm997_vm0, %v993_v56  ;;  %v2510_v58 = vor.u32 %v2702_v52, %v2507_v53  ;;  %v2645_v53 = vld [vmem:[#allocation5 + $0x14] sm:$0xf] }
 0x207   :  { %1000 = vst.msk [vmem:[%s3189_s10] sm:$0x3] %vm999_vm1, %v996_v34  ;;  %v2671_v34 = vld [vmem:[#allocation5 + $0xf8] sm:$0xf0]  ;;  %1496 = vmatpush.bf16.msrb.mxu1 %v2326_v63  ;;  %v2665_v63 = vld [vmem:[#allocation5 + $0xc0] sm:$0xf0] }
 0x208   :  { %v2354_v42 = vor.u32 %v2671_v34, %v2353_v33  ;;  %v2506_v33 = vor.u32 %v2706_v24, %v2505_v23  ;;  %v2693_v34 = vld [vmem:[#allocation5 + $0x1c4] sm:$0xf]  ;;  %v2338_v1 = vor.u32 %v2665_v63, %v2337_v62  ;;  %v2273_v23 = vld [vmem:[#allocation5 + $0x10] sm:$0xf]  ;;  %v2649_v24 = vld [vmem:[#allocation5 + $0x30] sm:$0xf0] }
 0x209   :  { %v2470_v45 = vor.u32 %v2693_v34, %v2467_v37  ;;  %v2339_v37 = vld [vmem:[#allocation5 + $0xc4] sm:$0xf0]  ;;  %v1016_v62 = vld [vmem:[%s3186_s7 + $0x4] sm:$0x3] }
 0x20a   :  { %1482 = vmatpush.bf16.msrb.mxu0 %v2354_v42  ;;  %v2689_v42 = vld [vmem:[#allocation5 + $0x198] sm:$0xf0]  ;;  %v1018_v63 = vperm.slane %v1016_v62, 0 }
 0x20b   :  { %1497 = vmatpush.bf16.msrb.mxu1 %v2294_v13  ;;  %v2434_v47 = vor.u32 %v2689_v42, %v2433_v41  ;;  %v2662_v41 = vld [vmem:[#allocation5 + $0xac] sm:$0xf]  ;;  %v2347_v42 = vld [vmem:[#allocation5 + $0xcc] sm:$0xf0] }
 0x20e   :  { %1483 = vmatpush.bf16.msrb.mxu0 %v2322_v54 }
 0x20f   :  { %1498 = vmatpush.bf16.msrb.mxu1 %v2262_v30  ;;  %v2674_v30 = vld [vmem:[#allocation5 + $0x110] sm:$0xf0] }
 0x212   :  { %1484 = vmatpush.bf16.msrb.mxu0 %v2290_v2  ;;  %v2685_v2 = vld [vmem:[#allocation5 + $0x17c] sm:$0xf] }
 0x213   :  { %v2438_v5 = vor.u32 %v2685_v2, %v2435_v3  ;;  %v2549_v2 = vld [vmem:[#allocation5 + $0x218] sm:$0xf]  ;;  %v2714_v3 = vld [vmem:[#allocation5 + $0x238] sm:$0xf0] }
 0x216   :  { %1485 = vmatpush.bf16.msrb.mxu0 %v2258_v17 }
 0x219   :  { %v1007_v20 = vpop.permute.xlu1 %1006 }
 0x21a   :  { %v1009_v22 = vmul.f32 %v1007_v20, %v1001_v12  ;;  %v2363_v12 = vld [vmem:[#allocation5 + $0x104] sm:$0xf0]  ;;  %v2701_v20 = vld [vmem:[#allocation5 + $0x20c] sm:$0xf]  ;;  %1530 = vmatpush.bf16.msra.mxu0 %v2498_v21  ;;  %v2410_v21 = vor.u32 %v2682_v18, %v2409_v16  ;;  %v2533_v18 = vld [vmem:[#allocation5 + $0xf8] sm:$0xf] }
 0x21b   :  { %v2366_v25 = vor.u32 %v2668_v9, %v2363_v12  ;;  %v2442_v9 = vor.u32 %v2690_v6, %v2441_v4  ;;  %v2657_v12 = vld [vmem:[#allocation5 + $0x78] sm:$0xf0]  ;;  %v2550_v6 = vor.u32 %v2714_v3, %v2549_v2 }
 0x21c   :  { %v1010_v32 = vadd.f32 %v1009_v22, %v993_v56  ;;  %v2329_v56 = vld [vmem:[#allocation5 + $0x98] sm:$0xf]  ;;  %v2499_v22 = vld [vmem:[#allocation5 + $0x22c] sm:$0xf0]  ;;  %v2306_v13 = vor.u32 %v2657_v12, %v2305_v11  ;;  %v2541_v11 = vld [vmem:[#allocation5 + $0x188] sm:$0xf] }
 0x21d   :  { %v2330_v0 = vor.u32 %v2664_v57, %v2329_v56  ;;  %v2369_v56 = vld [vmem:[#allocation5 + $0xe8] sm:$0xf]  ;;  %v2673_v57 = vld [vmem:[#allocation5 + $0x108] sm:$0xf0] }
 0x21e   :  { %v3023_v36 = vpack.c.bf16 %v1010_v32, %v1010_v32  ;;  %v2502_v32 = vor.u32 %v2701_v20, %v2499_v22  ;;  %v2370_v61 = vor.u32 %v2673_v57, %v2369_v56  ;;  %v2411_v20 = vld [vmem:[#allocation5 + $0x15c] sm:$0xf0]  ;;  %v2650_v57 = vld [vmem:[#allocation5 + $0x38] sm:$0xf0]  ;;  %v2712_v12 = vld [vmem:[#allocation5 + $0x1a8] sm:$0xf0] }
 0x21f   :  { %1509 = vmatpush.bf16.msrb.mxu2 %v2330_v0  ;;  %v2414_v22 = vor.u32 %v2678_v19, %v2411_v20  ;;  %v2710_v19 = vld [vmem:[#allocation5 + $0x118] sm:$0xf0] }
 0x220   :  { %2253 = vmatmul.msk.bf16.vlgmr.msra.gmra.mxu3 %vm1042_vm2, %v3023_v36  ;;  %1543 = vmatpush.bf16.msra.mxu1 %v2502_v32  ;;  %v2379_v32 = vld [vmem:[#allocation5 + $0x114] sm:$0xf0]  ;;  %v2534_v20 = vor.u32 %v2710_v19, %v2533_v18 }
 0x221   :  { %1517 = vmatpush.bf16.msra.mxu3 %v2494_v35  ;;  %v2466_v35 = vor.u32 %v2697_v27, %v2465_v26  ;;  %v2669_v26 = vld [vmem:[#allocation5 + $0xec] sm:$0xf]  ;;  %v2371_v27 = vld [vmem:[#allocation5 + $0x10c] sm:$0xf0] }
 0x222   :  { %v2374_v29 = vor.u32 %v2669_v26, %v2371_v27  ;;  %v2525_v26 = vld [vmem:[#allocation5 + $0x68] sm:$0xf]  ;;  %v2708_v27 = vld [vmem:[#allocation5 + $0x88] sm:$0xf0] }
 0x223   :  { %1510 = vmatpush.bf16.msrb.mxu2 %v2298_v14  ;;  %1531 = vmatpush.bf16.msra.mxu0 %v2466_v35  ;;  %v2677_v14 = vld [vmem:[#allocation5 + $0x134] sm:$0xf]  ;;  %v2661_v35 = vld [vmem:[#allocation5 + $0xa4] sm:$0xf] }
 0x224   :  { %1544 = vmatpush.bf16.msra.mxu1 %v2470_v45  ;;  %v2406_v17 = vor.u32 %v2677_v14, %v2403_v15  ;;  %v2342_v39 = vor.u32 %v2661_v35, %v2339_v37  ;;  %v2653_v45 = vld [vmem:[#allocation5 + $0x5c] sm:$0xf]  ;;  %v2537_v14 = vld [vmem:[#allocation5 + $0x140] sm:$0xf]  ;;  %v2711_v15 = vld [vmem:[#allocation5 + $0x160] sm:$0xf0] }
 0x225   :  { %1518 = vmatpush.bf16.msra.mxu3 %v2462_v48  ;;  %v2401_v48 = vld [vmem:[#allocation5 + $0x130] sm:$0xf]  ;;  %v3035_v35 = vld [vmem:[%s3186_s7 + $0x6] sm:$0xff] }
 0x226   :  { %v2402_v54 = vor.u32 %v2681_v49, %v2401_v48  ;;  %v2658_v48 = vld [vmem:[#allocation5 + $0x80] sm:$0xf0]  ;;  %v1142_v37 = vperm.slane %v3035_v35, 0 }
 0x227   :  { %1511 = vmatpush.bf16.msrb.mxu2 %v2266_v31  ;;  %1532 = vmatpush.bf16.msra.mxu0 %v2434_v47  ;;  %v2670_v31 = vld [vmem:[#allocation5 + $0xf4] sm:$0xf]  ;;  %v2313_v47 = vld [vmem:[#allocation5 + $0x60] sm:$0xf]  ;;  %v2654_v49 = vld [vmem:[#allocation5 + $0x64] sm:$0xf] }
 0x228   :  { %1545 = vmatpush.bf16.msra.mxu1 %v2438_v5  ;;  %v2382_v34 = vor.u32 %v2670_v31, %v2379_v32  ;;  %v2314_v51 = vor.u32 %v2658_v48, %v2313_v47  ;;  %v2318_v52 = vor.u32 %v2654_v49, %v2315_v50  ;;  %v2707_v31 = vld [vmem:[#allocation5 + $0x40] sm:$0xf0] }
 0x229   :  { %1519 = vmatpush.bf16.msra.mxu3 %v2430_v60  ;;  %v2475_v60 = vld [vmem:[#allocation5 + $0x1ec] sm:$0xf0] }
 0x22a   :  { %v2478_v0 = vor.u32 %v2694_v59, %v2475_v60  ;;  %v2283_v59 = vld [vmem:[#allocation5 + $0x3c] sm:$0xf0] }
 0x22b   :  { %1556 = vmatpush.bf16.msra.mxu2 %v2506_v33  ;;  %1533 = vmatpush.bf16.msra.mxu0 %v2402_v54  ;;  %v2378_v33 = vor.u32 %v2674_v30, %v2377_v28  ;;  %v2275_v54 = vld [vmem:[#allocation5 + $0x34] sm:$0xf0]  ;;  %v2526_v28 = vor.u32 %v2708_v27, %v2525_v26  ;;  %v2521_v30 = vld [vmem:[#allocation5 + $0x20] sm:$0xf] }
 0x22c   :  { %1546 = vmatpush.bf16.msra.mxu1 %v2406_v17  ;;  %v2278_v56 = vor.u32 %v2645_v53, %v2275_v54  ;;  %v2538_v17 = vor.u32 %v2711_v15, %v2537_v14  ;;  %v2522_v32 = vor.u32 %v2707_v31, %v2521_v30 }
 0x22d   :  { %1520 = vmatpush.bf16.msra.mxu3 %v2398_v8  ;;  %v2443_v8 = vld [vmem:[#allocation5 + $0x1a4] sm:$0xf0] }
 0x22e   :  { %v2446_v10 = vor.u32 %v2686_v7, %v2443_v8  ;;  %v2545_v7 = vld [vmem:[#allocation5 + $0x1d0] sm:$0xf]  ;;  %v2713_v8 = vld [vmem:[#allocation5 + $0x1f0] sm:$0xf0] }
 0x22f   :  { %1557 = vmatpush.bf16.msra.mxu2 %v2474_v46  ;;  %1534 = vmatpush.bf16.msra.mxu0 %v2370_v61  ;;  %v2307_v46 = vld [vmem:[#allocation5 + $0x7c] sm:$0xf0] }
 0x230   :  { %2254 = vmatmul.msk.bf16.vlgmr.msrb.gmra.mxu3 %vm1042_vm2, %v3023_v36  ;;  %v2302_v36 = vor.u32 %v2652_v43, %v2299_v44  ;;  %1547 = vmatpush.bf16.msra.mxu1 %v2374_v29  ;;  %v2350_v44 = vor.u32 %v2662_v41, %v2347_v42 }
 0x231   :  { %1521 = vmatpush.bf16.msra.mxu3 %v2366_v25  ;;  %v2274_v25 = vor.u32 %v2649_v24, %v2273_v23 }
 0x233   :  { %1535 = vmatpush.bf16.msra.mxu0 %v2338_v1  ;;  %1558 = vmatpush.bf16.msra.mxu2 %v2442_v9 }
 0x234   :  { %1548 = vmatpush.bf16.msra.mxu1 %v2342_v39 }
 0x235   :  { %1522 = vmatpush.bf16.msra.mxu3 %v2334_v40  ;;  %v2666_v40 = vld [vmem:[#allocation5 + $0xc8] sm:$0xf0] }
 0x236   :  { %v2346_v43 = vor.u32 %v2666_v40, %v2345_v38  ;;  %v1143_v38 = vperm.slane %v3035_v35, 1 }
 0x237   :  { %1536 = vmatpush.bf16.msra.mxu0 %v2306_v13  ;;  %1559 = vmatpush.bf16.msra.mxu2 %v2410_v21  ;;  %v2542_v13 = vor.u32 %v2712_v12, %v2541_v11  ;;  %v2529_v21 = vld [vmem:[#allocation5 + $0xb0] sm:$0xf] }
 0x239   :  { %1523 = vmatpush.bf16.msra.mxu3 %v2302_v36  ;;  %v2310_v36 = vor.u32 %v2653_v45, %v2307_v46  ;;  %v1144_v45 = vperm.slane %v3035_v35, 2  ;;  %v1145_v46 = vperm.slane %v3035_v35, 3 }
 0x23b   :  { %1537 = vmatpush.bf16.msra.mxu0 %v2274_v25  ;;  %1560 = vmatpush.bf16.msra.mxu2 %v2378_v33  ;;  %v1019_v25 = vperm.slane %v1016_v62, 1 }
 0x23c   :  { %1549 = vmatpush.bf16.msra.mxu1 %v2310_v36 }
 0x23d   :  { %1524 = vmatpush.bf16.msra.mxu3 %v2270_v55  ;;  %v2281_v55 = vld [vmem:[#allocation5 + $0x18] sm:$0xf] }
 0x23e   :  { %v2282_v60 = vor.u32 %v2650_v57, %v2281_v55 }
 0x23f   :  { %1561 = vmatpush.bf16.msra.mxu2 %v2346_v43 }
 0x240   :  { %1550 = vmatpush.bf16.msra.mxu1 %v2278_v56 }
 0x241   :  { %1569 = vmatpush.bf16.msrb.mxu3 %v2510_v58  ;;  %v2646_v58 = vld [vmem:[#allocation5 + $0x1c] sm:$0xf] }
 0x242   :  { %v2286_v61 = vor.u32 %v2646_v58, %v2283_v59  ;;  %v1146_v58 = vperm.slane %v3035_v35, 4  ;;  %v1147_v59 = vperm.slane %v3035_v35, 5 }
 0x243   :  { %1562 = vmatpush.bf16.msra.mxu2 %v2314_v51 }
 0x245   :  { %1570 = vmatpush.bf16.msrb.mxu3 %v2478_v0 }
 0x247   :  { %1563 = vmatpush.bf16.msra.mxu2 %v2282_v60 }
 0x249   :  { %1571 = vmatpush.bf16.msrb.mxu3 %v2446_v10  ;;  %v2546_v10 = vor.u32 %v2713_v8, %v2545_v7 }
 0x24d   :  { %1572 = vmatpush.bf16.msrb.mxu3 %v2414_v22  ;;  %v2709_v22 = vld [vmem:[#allocation5 + $0xd0] sm:$0xf0] }
 0x24e   :  { %v2530_v24 = vor.u32 %v2709_v22, %v2529_v21 }
 0x251   :  { %1573 = vmatpush.bf16.msrb.mxu3 %v2382_v34 }
 0x255   :  { %1574 = vmatpush.bf16.msrb.mxu3 %v2350_v44 }
 0x259   :  { %1575 = vmatpush.bf16.msrb.mxu3 %v2318_v52 }
 0x25d   :  { %1576 = vmatpush.bf16.msrb.mxu3 %v2286_v61 }
 0x2a3   :  { %v1055_v0 = vpop.f32.mrf.mxu3 }
 0x2a4   :  { %v1056_v1 = vadd.f32 %v1055_v0, %v1018_v63 }
 0x2a6   :  { %v1072_v4 = vmax.f32 %v1056_v1, 0.0 }
 0x2a8   :  { %v1074_v5 = vpack.c.bf16 %v1072_v4, %v1072_v4 }
 0x2aa   :  { %1486 = vmatmul.bf16.vlgmr.msrb.gmra.mxu0 %v1074_v5  ;;  %1499 = vmatmul.bf16.vlgmr.msrb.gmra.mxu1 %v1074_v5 }
 0x2ab   :  { %1512 = vmatmul.bf16.vlgmr.msrb.gmra.mxu2 %v1074_v5  ;;  %1525 = vmatmul.bf16.vlgmr.msra.gmra.mxu3 %v1074_v5  ;;  %v1057_v9 = vpop.f32.mrf.mxu3 }
 0x2ac   :  { %1829 = vmatpush.bf16.msrb.mxu0 %v2550_v6 }
 0x2b0   :  { %1830 = vmatpush.bf16.msrb.mxu0 %v2546_v10  ;;  %v1148_v10 = vperm.slane %v3035_v35, 6 }
 0x2b3   :  { %v1068_v16 = vpop.f32.mrf.mxu3 }
 0x2b4   :  { %1831 = vmatpush.bf16.msrb.mxu0 %v2542_v13  ;;  %v1069_v29 = vadd.f32 %v1068_v16, %v1019_v25  ;;  %v1149_v13 = vperm.slane %v3035_v35, 7 }
 0x2b6   :  { %v1073_v33 = vmax.f32 %v1069_v29, 0.0 }
 0x2b8   :  { %1832 = vmatpush.bf16.msrb.mxu0 %v2538_v17  ;;  %v1075_v34 = vpack.c.bf16 %v1073_v33, %v1073_v33 }
 0x2ba   :  { %1538 = vmatmul.bf16.vlgmr.msra.gmra.mxu0 %v1074_v5  ;;  %1551 = vmatmul.bf16.vlgmr.msra.gmra.mxu1 %v1074_v5 }
 0x2bb   :  { %1564 = vmatmul.bf16.vlgmr.msra.gmra.mxu2 %v1074_v5  ;;  %1577 = vmatmul.bf16.vlgmr.msrb.gmra.mxu3 %v1074_v5  ;;  %v1070_v23 = vpop.f32.mrf.mxu3 }
 0x2bc   :  { %1833 = vmatpush.bf16.msrb.mxu0 %v2534_v20 }
 0x2c0   :  { %1834 = vmatpush.bf16.msrb.mxu0 %v2530_v24 }
 0x2c4   :  { %1835 = vmatpush.bf16.msrb.mxu0 %v2526_v28 }
 0x2c8   :  { %1836 = vmatpush.bf16.msrb.mxu0 %v2522_v32 }
 0x2cb   :  { %1837 = vmatmul.bf16.vlgmr.msrb.gmra.mxu0 %v1075_v34 }
 0x327   :  { %v1487_v39 = vpop.f32.mrf.mxu0  ;;  %v1500_v40 = vpop.f32.mrf.mxu1 }
 0x328   :  { %v1488_v41 = vadd.f32 %v1487_v39, %v1142_v37  ;;  %v1501_v42 = vadd.f32 %v1500_v40, %v1143_v38 }
 0x32a   :  { %v2511_v43 = vmul.f32 -1.442695, %v1488_v41  ;;  %v2512_v44 = vmul.f32 -1.442695, %v1501_v42 }
 0x32c   :  { %2742 = vpow2.f32 %v2511_v43 }
 0x32d   :  { %2744 = vpow2.f32 %v2512_v44 }
 0x32e   :  { %v1513_v47 = vpop.f32.mrf.mxu2  ;;  %v1526_v36 = vpop.f32.mrf.mxu3 }
 0x32f   :  { %v1514_v48 = vadd.f32 %v1513_v47, %v1144_v45  ;;  %v1527_v49 = vadd.f32 %v1526_v36, %v1145_v46  ;;  %v1489_v50 = vpop.f32.mrf.mxu0  ;;  %v1502_v51 = vpop.f32.mrf.mxu1 }
 0x331   :  { %v2513_v52 = vmul.f32 -1.442695, %v1514_v48  ;;  %v2514_v53 = vmul.f32 -1.442695, %v1527_v49 }
 0x332   :  { %v2743_v54 = vpop.eup %2742 }
 0x333   :  { %v2745_v55 = vpop.eup %2744  ;;  %v3041_v56 = vadd.f32 1.0, %v2743_v54  ;;  %2746 = vpow2.f32 %v2513_v52 }
 0x334   :  { %v1607_v57 = vadd.f32 1.0, %v2745_v55  ;;  %2748 = vpow2.f32 %v2514_v53 }
 0x335   :  { %2750 = vrcp.f32 %v3041_v56  ;;  %vm1619_vm3 = vweird.f32 %v3041_v56  ;;  %v1623_v26 = vand.u32 2147483647, %v3041_v56 }
 0x336   :  { %2752 = vrcp.f32 %v1607_v57  ;;  %v1515_v60 = vpop.f32.mrf.mxu2  ;;  %v1528_v61 = vpop.f32.mrf.mxu3  ;;  %v1638_v17 = vand.u32 2147483647, %v1607_v57  ;;  %v1640_v21 = vand.u32 2147483648, %v1607_v57  ;;  %vm1634_vm4 = vweird.f32 %v1607_v57 }
 0x337   :  { %v1539_v62 = vpop.f32.mrf.mxu0  ;;  %v1552_v63 = vpop.f32.mrf.mxu1  ;;  %v2727_v60 = vld [vmem:[%s3186_s7 + $0xe] ss:$0 sm:$0xff]  ;;  %s1852_s7 = sshll.u32 %s3188_s9, 4  ;;  %s1853_s7 = int_to_ptr.hbm [resolvable:$true] %s1852_s7 }
 0x338   :  { %v1540_v0 = vadd.f32 %v1539_v62, %v1146_v58  ;;  %v1553_v2 = vadd.f32 %v1552_v63, %v1147_v59  ;;  %vm3068_vm6 = vcmp.eq.f32.partialorder %v1638_v17, 8.507059e+37  ;;  %v1641_v34 = vor.u32 1.1754944e-38, %v1640_v21 }
 0x339   :  { %v2747_v1 = vpop.eup %2746 }
 0x33a   :  { %v2749_v3 = vpop.eup %2748  ;;  %v3046_v4 = vadd.f32 1.0, %v2747_v1  ;;  %v2515_v9 = vmul.f32 -1.442695, %v1540_v0  ;;  %v2516_v12 = vmul.f32 -1.442695, %v1553_v2 }
 0x33b   :  { %v3048_v5 = vpop.eup %2750  ;;  %v3050_v6 = vadd.f32 1.0, %v2749_v3 }
 0x33c   :  { %v3052_v7 = vpop.eup %2752  ;;  %v1615_v8 = vmul.f32 %v3048_v5, %v3041_v56  ;;  %2754 = vrcp.f32 %v3046_v4  ;;  %vm1620_vm7 = vweird.f32 %v3048_v5  ;;  %vm1649_vm8 = vweird.f32 %v3046_v4 }
 0x33d   :  { %v1630_v11 = vmul.f32 %v3052_v7, %v1607_v57  ;;  %2756 = vrcp.f32 %v3050_v6  ;;  %vm1635_vm5 = vweird.f32 %v3052_v7  ;;  %v1653_v40 = vand.u32 2147483647, %v3046_v4  ;;  %vm3107_vm15 = vmor %vm1619_vm3, %vm1620_vm7 }
 0x33e   :  { %v1565_v14 = vpop.f32.mrf.mxu2  ;;  %v1578_v15 = vpop.f32.mrf.mxu3  ;;  %v1616_v20 = vsub.f32 1.0, %v1615_v8  ;;  %2758 = vpow2.f32 %v2515_v9  ;;  %vm3076_vm9 = vmor %vm1634_vm4, %vm1635_vm5  ;;  %v1655_v41 = vand.u32 2147483648, %v3046_v4  ;;  %v1668_v49 = vand.u32 2147483647, %v3050_v6 }
 0x33f   :  { %v1631_v16 = vsub.f32 1.0, %v1630_v11  ;;  %v1541_v18 = vpop.f32.mrf.mxu0  ;;  %v1554_v19 = vpop.f32.mrf.mxu1  ;;  %v1566_v22 = vadd.f32 %v1565_v14, %v1148_v10  ;;  %2760 = vpow2.f32 %v2516_v12  ;;  %v1579_v24 = vadd.f32 %v1578_v15, %v1149_v13 }
 0x340   :  { %v1617_v32 = vmul.f32 %v3048_v5, %v1616_v20  ;;  %v1670_v50 = vand.u32 2147483648, %v3050_v6  ;;  %v1625_v57 = vand.u32 2147483648, %v3041_v56  ;;  %v1656_v59 = vor.u32 1.1754944e-38, %v1655_v41 }
 0x341   :  { %v1632_v23 = vmul.f32 %v3052_v7, %v1631_v16  ;;  %v2517_v27 = vmul.f32 -1.442695, %v1566_v22  ;;  %v2518_v30 = vmul.f32 -1.442695, %v1579_v24  ;;  %vm1654_vm0 = vcmp.eq.f32.partialorder %v1653_v40, 8.507059e+37 }
 0x342   :  { %v2755_v25 = vpop.eup %2754  ;;  %v1618_v48 = vadd.f32 %v3048_v5, %v1617_v32  ;;  %vm1664_vm1 = vweird.f32 %v3050_v6  ;;  %vm1669_vm3 = vcmp.eq.f32.partialorder %v1668_v49, 8.507059e+37  ;;  %v1671_v3 = vor.u32 1.1754944e-38, %v1670_v50 }
 0x343   :  { %v1633_v28 = vadd.f32 %v3052_v7, %v1632_v23  ;;  %v1645_v29 = vmul.f32 %v2755_v25, %v3046_v4  ;;  %v2757_v31 = vpop.eup %2756  ;;  %2762 = vpow2.f32 %v2517_v27  ;;  %vm1650_vm11 = vweird.f32 %v2755_v25 }
 0x344   :  { %v1660_v37 = vmul.f32 %v2757_v31, %v3050_v6  ;;  %v2759_v38 = vpop.eup %2758  ;;  %2764 = vpow2.f32 %v2518_v30  ;;  %vm1665_vm13 = vweird.f32 %v2757_v31  ;;  %vm1651_vm14 = vmor %vm1649_vm8, %vm1650_vm11  ;;  %v1622_v1 = vsel %vm3107_vm15, %v3048_v5, %v1618_v48 }
 0x345   :  { %v1646_v35 = vsub.f32 1.0, %v1645_v29  ;;  %v2761_v44 = vpop.eup %2760  ;;  %v1637_v45 = vsel %vm3076_vm9, %v3052_v7, %v1633_v28  ;;  %v3085_v36 = vadd.f32 1.0, %v2759_v38  ;;  %vm1666_vm2 = vmor %vm1664_vm1, %vm1665_vm13  ;;  %v1626_v9 = vor.u32 1.1754944e-38, %v1625_v57 }
 0x346   :  { %v1567_v42 = vpop.f32.mrf.mxu2  ;;  %v1580_v43 = vpop.f32.mrf.mxu3  ;;  %v1661_v47 = vsub.f32 1.0, %v1660_v37  ;;  %v3090_v51 = vadd.f32 1.0, %v2761_v44  ;;  %v1642_v58 = vsel %vm3068_vm6, %v1641_v34, %v1637_v45  ;;  %vm1624_vm4 = vcmp.eq.f32.partialorder %v1623_v26, 8.507059e+37 }
 0x347   :  { %v1647_v46 = vmul.f32 %v2755_v25, %v1646_v35  ;;  %2766 = vrcp.f32 %v3085_v36  ;;  %v1742_v4 = vrot.slane %v1642_v58, 6  ;;  %vm1752_vm5 = vcmask 1043456  }
 0x348   :  { %v1838_v52 = vpop.f32.mrf.mxu0  ;;  %v1662_v54 = vmul.f32 %v2757_v31, %v1661_v47  ;;  %2768 = vrcp.f32 %v3090_v51  ;;  %v1627_v15 = vsel %vm1624_vm4, %v1626_v9, %v1622_v1  ;;  %v1700_v23 = vand.u32 2147483648, %v3090_v51 }
 0x349   :  { %v1648_v53 = vadd.f32 %v2755_v25, %v1647_v46  ;;  %v2763_v55 = vpop.eup %2762  ;;  %v1839_v12 = vadd.f32 %v2727_v60, %v1838_v52  ;;  %v1749_v18 = vsel %vm1748_vm10, %v1627_v15, %v1742_v4  ;;  %vm1694_vm7 = vweird.f32 %v3090_v51 }
 0x34a   :  { %v1663_v63 = vadd.f32 %v2757_v31, %v1662_v54  ;;  %v2765_v0 = vpop.eup %2764  ;;  %v3121_v8 = vadd.f32 1.0, %v2763_v55  ;;  %v1698_v30 = vand.u32 2147483647, %v3090_v51  ;;  %vm1679_vm8 = vweird.f32 %v3085_v36 }
 0x34b   :  { %v1652_v62 = vsel %vm1651_vm14, %v2755_v25, %v1648_v53  ;;  %v3123_v11 = vadd.f32 1.0, %v2765_v0  ;;  %1842 = vst [vmem:[#allocation7] sm:$0x3] %v1839_v12  ;;  %v1701_v33 = vor.u32 1.1754944e-38, %v1700_v23  ;;  %v1685_v46 = vand.u32 2147483648, %v3085_v36 }
 0x34c   :  { %v1657_v2 = vsel %vm1654_vm0, %v1656_v59, %v1652_v62  ;;  %v1667_v7 = vsel %vm1666_vm2, %v2757_v31, %v1663_v63  ;;  %2770 = vrcp.f32 %v3121_v8  ;;  %1855 = dma.vmem_to_hbm [thread:$0]  %s1851_s26, 32, %s1853_s7, [#allocation4]   ;;  %v1713_v35 = vand.u32 2147483647, %v3121_v8 }
 0x34d   :  { %v1743_v6 = vrot.slane %v1657_v2, 4  ;;  %v1672_v10 = vsel %vm1669_vm3, %v1671_v3, %v1667_v7  ;;  %v3126_v13 = vpop.eup %2766  ;;  %2772 = vrcp.f32 %v3123_v11  ;;  %v1715_v38 = vand.u32 2147483648, %v3121_v8 }
 0x34e   :  { %v1744_v5 = vrot.slane %v1672_v10, 2  ;;  %v2769_v14 = vpop.eup %2768  ;;  %v1675_v16 = vmul.f32 %v3126_v13, %v3085_v36  ;;  %vm1680_vm11 = vweird.f32 %v3126_v13  ;;  %v1728_v41 = vand.u32 2147483647, %v3123_v11 }
 0x34f   :  { %v1690_v56 = vmul.f32 %v2769_v14, %v3090_v51  ;;  %vm1695_vm6 = vweird.f32 %v2769_v14  ;;  %v1730_v42 = vand.u32 2147483648, %v3123_v11  ;;  %vm1699_vm14 = vcmp.eq.f32.partialorder %v1698_v30, 8.507059e+37  ;;  %vm3162_vm0 = vmor %vm1679_vm8, %vm1680_vm11 }
 0x350   :  { %v1840_v17 = vpop.f32.mrf.mxu0  ;;  %v1751_v19 = vsel %vm1750_vm12, %v1743_v6, %v1744_v5  ;;  %v1676_v21 = vsub.f32 1.0, %v1675_v16  ;;  %vm3148_vm9 = vmor %vm1694_vm7, %vm1695_vm6  ;;  %vm1709_vm1 = vweird.f32 %v3121_v8  ;;  %v1683_v49 = vand.u32 2147483647, %v3085_v36 }
 0x351   :  { %v1753_v20 = vsel %vm1752_vm5, %v1749_v18, %v1751_v19  ;;  %v1691_v22 = vsub.f32 1.0, %v1690_v56  ;;  %v1716_v50 = vor.u32 1.1754944e-38, %v1715_v38  ;;  %vm1724_vm3 = vweird.f32 %v3123_v11 }
 0x352   :  { %1759 = vst [vmem:[%s3187_s8] sm:$0xff] %v1753_v20  ;;  %v2771_v24 = vpop.eup %2770  ;;  %v1677_v28 = vmul.f32 %v3126_v13, %v1676_v21  ;;  %vm1714_vm4 = vcmp.eq.f32.partialorder %v1713_v35, 8.507059e+37  ;;  %vm1729_vm7 = vcmp.eq.f32.partialorder %v1728_v41, 8.507059e+37  ;;  %v1731_v53 = vor.u32 1.1754944e-38, %v1730_v42 }
 0x353   :  { %v1692_v25 = vmul.f32 %v2769_v14, %v1691_v22  ;;  %v2773_v26 = vpop.eup %2772  ;;  %v1705_v27 = vmul.f32 %v2771_v24, %v3121_v8  ;;  %vm1710_vm13 = vweird.f32 %v2771_v24  ;;  %v1686_v59 = vor.u32 1.1754944e-38, %v1685_v46 }
 0x354   :  { %v1720_v31 = vmul.f32 %v2773_v26, %v3123_v11  ;;  %v1678_v43 = vadd.f32 %v3126_v13, %v1677_v28  ;;  %vm1725_vm15 = vweird.f32 %v2773_v26  ;;  %vm1711_vm2 = vmor %vm1709_vm1, %vm1710_vm13  ;;  %vm1684_vm8 = vcmp.eq.f32.partialorder %v1683_v49, 8.507059e+37 }
 0x355   :  { %v1693_v29 = vadd.f32 %v2769_v14, %v1692_v25  ;;  %v1706_v34 = vsub.f32 1.0, %v1705_v27  ;;  %vm1726_vm6 = vmor %vm1724_vm3, %vm1725_vm15 }
 0x356   :  { %v1721_v39 = vsub.f32 1.0, %v1720_v31  ;;  %v1682_v54 = vsel %vm3162_vm0, %v3126_v13, %v1678_v43 }
 0x357   :  { %v1697_v37 = vsel %vm3148_vm9, %v2769_v14, %v1693_v29  ;;  %v1707_v40 = vmul.f32 %v2771_v24, %v1706_v34  ;;  %v1687_v62 = vsel %vm1684_vm8, %v1686_v59, %v1682_v54 }
 0x358   :  { %v1722_v44 = vmul.f32 %v2773_v26, %v1721_v39  ;;  %v1702_v47 = vsel %vm1699_vm14, %v1701_v33, %v1697_v37 }
 0x359   :  { %v1708_v48 = vadd.f32 %v2771_v24, %v1707_v40  ;;  %v1745_v55 = vrot.slane %v1702_v47, 6 }
 0x35a   :  { %v1723_v51 = vadd.f32 %v2773_v26, %v1722_v44 }
 0x35b   :  { %v1712_v52 = vsel %vm1711_vm2, %v2771_v24, %v1708_v48  ;;  %v1754_v63 = vsel %vm1748_vm10, %v1687_v62, %v1745_v55 }
 0x35c   :  { %v1717_v57 = vsel %vm1714_vm4, %v1716_v50, %v1712_v52  ;;  %v1727_v58 = vsel %vm1726_vm6, %v2773_v26, %v1723_v51 }
 0x35d   :  { %v1746_v60 = vrot.slane %v1717_v57, 4  ;;  %v1732_v36 = vsel %vm1729_vm7, %v1731_v53, %v1727_v58 }
 0x35e   :  { %v1747_v61 = vrot.slane %v1732_v36, 2 }
 0x360   :  { %v1755_v0 = vsel %vm1750_vm12, %v1746_v60, %v1747_v61 }
 0x361   :  { %v1756_v1 = vsel %vm1752_vm5, %v1754_v63, %v1755_v0 }
 0x362   :  { %1760 = vst [vmem:[%s3187_s8 + $0x8] sm:$0xff] %v1756_v1 }
 0x363   :  { %2850 = dma.done.wait [#allocation4], 32  }
 0x364   :  { %2851 = vsyncadd [#allocation4], 4294967264 }
 0x365   :  { %1866 = vsyncpa [#allocation3], 1 }
 0x366   :  { %1867 = vsyncpa [#allocation6], 1 }
 0x367   :  { %1868 = vsyncpa [#allocation4], 1 }

</bundles_post_ra>
